<compile_context>
chip_gen: v7x
topology: tpu7x:2x2x1
jax: 0.10.0
libtpu: 0.0.40
codegen_flags: <defaults>
</compile_context>

<pallas_src>
import functools

import jax
import jax.numpy as jnp
import numpy as np
from jax.experimental import pallas as pl
from jax.experimental.pallas import tpu as pltpu


# ----------------------------------------------------------------------------
# Fully fused TransformerMapper kernel (one grid step = block_b batch elements)
# ----------------------------------------------------------------------------
def _mapper_kernel(
    x_ref,          # (TB, 1, dim_clip)    f32
    prefix_ref,     # (P, D)               f32
    lin_w_ref,      # (dim_clip, CL*D)     bf16  (pre-transposed, fused)
    lin_b_ref,      # (1, CL*D)            f32
    n1w_ref, n1b_ref,       # (L, 1, D)    f32
    wqkv_ref,               # (L, D, 3*D)  bf16  (scale folded into Q columns)
    wproj_ref,              # (L, D, D)    bf16
    bproj_ref,              # (L, 1, D)    f32
    n2w_ref, n2b_ref,       # (L, 1, D)    f32
    w1_ref,                 # (L, D, hidden)  bf16
    b1_ref,                 # (L, 1, hidden)  f32
    w2_ref,                 # (L, hidden, D)  bf16
    b2_ref,                 # (L, 1, D)       f32
    o_ref,                  # (TB, P, D)      f32
    *, num_layers, num_heads, clip_length,
):
    bf16, f32 = jnp.bfloat16, jnp.float32
    TB = x_ref.shape[0]
    P, D = prefix_ref.shape
    CL = clip_length
    N = CL + P
    H = num_heads
    hd = D // H

    def layernorm(v, w, b):
        # single pass: E[x^2] - E[x]^2 keeps the two XLU lane reductions independent
        mu = jnp.mean(v, axis=-1, keepdims=True)
        mu2 = jnp.mean(v * v, axis=-1, keepdims=True)
        var = mu2 - mu * mu
        return (v - mu) * jax.lax.rsqrt(var + 1e-5) * w + b

    # ---- mapping linear: ONE lane-dense (TB, dc) x (dc, CL*D) matmul ----
    x2 = x_ref[...][:, 0, :].astype(bf16)                            # (TB, dc)
    mapped = (jnp.dot(x2, lin_w_ref[...], preferred_element_type=f32)
              + lin_b_ref[...])                                       # (TB, CL*D) f32

    # interleave mapped tokens and the learned prefix into one (TB*N, D) slab
    rows = []
    for b in range(TB):
        for t in range(CL):
            rows.append(mapped[b:b + 1, t * D:(t + 1) * D])          # (1, D)
        rows.append(prefix_ref[...])                                 # (P, D)
    seq = jnp.concatenate(rows, axis=0)                              # (TB*N, D) f32

    # ---- transformer layers (statically unrolled, weights stacked on axis 0) ----
    for l in range(num_layers):
        # -- self-attention (pre-LN): fused QKV + head-batched contractions --
        hln = layernorm(seq, n1w_ref[l], n1b_ref[l]).astype(bf16)    # (TB*N, D)
        qkv = jnp.dot(hln, wqkv_ref[l], preferred_element_type=f32)  # (TB*N, 3D) f32

        attn_rows = []
        for b in range(TB):
            qkv_b = qkv[b * N:(b + 1) * N, :]                        # (N, 3D)
            qh = jnp.stack([qkv_b[:, h * hd:(h + 1) * hd]
                            for h in range(H)])                      # (H, N, hd)
            kh = jnp.stack([qkv_b[:, D + h * hd:D + (h + 1) * hd]
                            for h in range(H)])
            vh = jnp.stack([qkv_b[:, 2 * D + h * hd:2 * D + (h + 1) * hd]
                            for h in range(H)])
            # scores for all heads at once (scale already folded into Q weights)
            s = jnp.einsum('hnd,hmd->hnm', qh.astype(bf16), kh.astype(bf16),
                           preferred_element_type=f32)               # (H, N, N) f32
            s = s - jnp.max(s, axis=-1, keepdims=True)
            e = jnp.exp(s)
            p = (e * pl.reciprocal(jnp.sum(e, axis=-1, keepdims=True),
                                   approx=True)).astype(bf16)
            ho = jnp.einsum('hnm,hmd->hnd', p, vh.astype(bf16),
                            preferred_element_type=f32)              # (H, N, hd) f32
            # assemble heads back into one (N, D) slab (single projection matmul)
            attn_rows.append(jnp.concatenate([ho[h] for h in range(H)], axis=1))
        attn_in = jnp.concatenate(attn_rows, axis=0).astype(bf16)    # (TB*N, D)
        attn = (jnp.dot(attn_in, wproj_ref[l], preferred_element_type=f32)
                + bproj_ref[l])
        seq = seq + attn

        # -- MLP (pre-LN) --
        h2 = layernorm(seq, n2w_ref[l], n2b_ref[l]).astype(bf16)
        m = jnp.dot(h2, w1_ref[l], preferred_element_type=f32) + b1_ref[l]
        m = jnp.maximum(m, 0.0).astype(bf16)
        seq = seq + (jnp.dot(m, w2_ref[l], preferred_element_type=f32) + b2_ref[l])

    # ---- keep only the prefix positions ----
    for b in range(TB):
        o_ref[b] = seq[b * N + CL:(b + 1) * N, :]


def _const_spec(arr):
    nd = arr.ndim
    return pl.BlockSpec(arr.shape, lambda i, _nd=nd: (0,) * _nd)


def transformer_mapper_pallas(x, kparams, clip_length, prefix_length,
                              dim_embedding, num_layers, num_heads=8,
                              block_b=None):
    """x: (B, dim_clip) f32; kparams: output of prepare_kernel_params."""
    B, dim_clip = x.shape
    D = dim_embedding
    if block_b is None:
        # >=2 grid steps when possible so both v7x TensorCores get work;
        # on single-TC v5e/v6e pass block_b=B to process the whole batch per step.
        block_b = 1 if B % 2 else max(1, B // 2)
    assert B % block_b == 0
    x3 = x.reshape(B, 1, dim_clip)

    inputs = (
        x3, kparams["prefix"], kparams["lin_w"], kparams["lin_b"],
        kparams["n1w"], kparams["n1b"],
        kparams["wqkv"], kparams["wproj"], kparams["bproj"],
        kparams["n2w"], kparams["n2b"],
        kparams["w1"], kparams["b1"], kparams["w2"], kparams["b2"],
    )

    kernel = functools.partial(
        _mapper_kernel,
        num_layers=num_layers, num_heads=num_heads, clip_length=clip_length,
    )

    in_specs = [pl.BlockSpec((block_b, 1, dim_clip), lambda i: (i, 0, 0))]
    in_specs += [_const_spec(a) for a in inputs[1:]]

    return pl.pallas_call(
        kernel,
        out_shape=jax.ShapeDtypeStruct((B, prefix_length, D), jnp.float32),
        grid=(B // block_b,),
        in_specs=in_specs,
        out_specs=pl.BlockSpec((block_b, prefix_length, D), lambda i: (i, 0, 0)),
        compiler_params=pltpu.CompilerParams(
            dimension_semantics=("parallel",),
            # toy-scale weights are <1 MiB; re-derive per chip at real CLIP scale
            vmem_limit_bytes=32 * 1024 * 1024,
        ),
    )(*inputs)


# ----------------------------------------------------------------------------
# Parameter construction (PyTorch nn.Linear convention: W (out,in), y = xW^T+b)
# ----------------------------------------------------------------------------
def init_params(key, dim_clip, dim_embedding, prefix_length, clip_length,
                num_layers, mlp_ratio=2.0):
    D = dim_embedding
    hidden = int(D * mlp_ratio)
    ks = iter(jax.random.split(key, 8 * num_layers + 4))

    def w(shape, scale=0.02):
        return jax.random.normal(next(ks), shape, jnp.float32) * scale

    params = {
        "lin_w": w((clip_length * D, dim_clip)),       # nn.Linear(dim_clip, L*D)
        "lin_b": w((1, clip_length * D)),
        "prefix_const": jax.random.normal(next(ks), (prefix_length, D), jnp.float32),
        "layers": [],
    }
    for _ in range(num_layers):
        params["layers"].append({
            "n1w": jnp.ones((1, D), jnp.float32),
            "n1b": jnp.zeros((1, D), jnp.float32),
            "wq": w((D, D)),          # to_queries (bias=False)
            "wkv": w((2 * D, D)),     # to_keys_values (bias=False)
            "wproj": w((D, D)),       # project
            "bproj": w((1, D)),
            "n2w": jnp.ones((1, D), jnp.float32),
            "n2b": jnp.zeros((1, D), jnp.float32),
            "w1": w((hidden, D)),     # MLP fc1
            "b1": w((1, hidden)),
            "w2": w((D, hidden)),     # MLP fc2
            "b2": w((1, D)),
        })
    return params


def prepare_kernel_params(params, num_heads):
    """Pre-transpose / fuse / bf16-cast weights for the fused kernel."""
    D = params["layers"][0]["wq"].shape[0]
    hd = D // num_heads
    scale = hd ** (-0.5)
    bf = jnp.bfloat16

    def stack(fn):
        return jnp.stack([fn(p) for p in params["layers"]])

    return {
        "prefix": params["prefix_const"],                              # (P, D)
        "lin_w": params["lin_w"].T.astype(bf),                         # (dc, CL*D)
        "lin_b": params["lin_b"],                                      # (1, CL*D)
        "n1w": stack(lambda p: p["n1w"]),                              # (L, 1, D)
        "n1b": stack(lambda p: p["n1b"]),
        # fused QKV with the attention scale folded into the Q columns
        "wqkv": stack(lambda p: jnp.concatenate(
            [(scale * p["wq"]).T, p["wkv"][:D].T, p["wkv"][D:].T],
            axis=1)).astype(bf),                                       # (L, D, 3D)
        "wproj": stack(lambda p: p["wproj"].T).astype(bf),             # (L, D, D)
        "bproj": stack(lambda p: p["bproj"]),                          # (L, 1, D)
        "n2w": stack(lambda p: p["n2w"]),
        "n2b": stack(lambda p: p["n2b"]),
        "w1": stack(lambda p: p["w1"].T).astype(bf),                   # (L, D, h)
        "b1": stack(lambda p: p["b1"]),                                # (L, 1, h)
        "w2": stack(lambda p: p["w2"].T).astype(bf),                   # (L, h, D)
        "b2": stack(lambda p: p["b2"]),                                # (L, 1, D)
    }


# ----------------------------------------------------------------------------
# Pure-JAX f32 reference (mirrors the PyTorch module exactly)
# ----------------------------------------------------------------------------
def transformer_mapper_ref(x, params, clip_length, dim_embedding, num_heads=8):
    B = x.shape[0]
    D = dim_embedding
    hd = D // num_heads
    mapped = x @ params["lin_w"].T + params["lin_b"][0]
    mapped = mapped.reshape(B, clip_length, D)
    prefix = jnp.broadcast_to(
        params["prefix_const"][None], (B,) + params["prefix_const"].shape)
    seq = jnp.concatenate([mapped, prefix], axis=1)

    def ln(v, w, b):
        mu = jnp.mean(v, axis=-1, keepdims=True)
        var = jnp.mean((v - mu) ** 2, axis=-1, keepdims=True)
        return (v - mu) * jax.lax.rsqrt(var + 1e-5) * w[0] + b[0]

    for p in params["layers"]:
        h = ln(seq, p["n1w"], p["n1b"])
        q = h @ p["wq"].T
        kv = h @ p["wkv"].T
        k, v = kv[..., :D], kv[..., D:]
        n = seq.shape[1]
        qh = q.reshape(B, n, num_heads, hd)
        kh = k.reshape(B, n, num_heads, hd)
        vh = v.reshape(B, n, num_heads, hd)
        att = jnp.einsum("bnhd,bmhd->bnmh", qh, kh) * (hd ** -0.5)
        att = jax.nn.softmax(att, axis=2)
        out = jnp.einsum("bnmh,bmhd->bnhd", att, vh).reshape(B, n, D)
        out = out @ p["wproj"].T + p["bproj"][0]
        seq = seq + out
        h2 = ln(seq, p["n2w"], p["n2b"])
        m = jnp.maximum(h2 @ p["w1"].T + p["b1"][0], 0.0)
        m = m @ p["w2"].T + p["b2"][0]
        seq = seq + m
    return seq[:, clip_length:]


# ----------------------------------------------------------------------------
if __name__ == "__main__":
    # Small config consistent with TransformerMapper(dim_clip, dim_embedding,
    # prefix_length, clip_length, num_layers); num_heads is fixed at 8.
    B = 2
    dim_clip = 64
    dim_embedding = 64
    prefix_length = 4
    clip_length = 4
    num_layers = 2
    num_heads = 8

    key = jax.random.PRNGKey(0)
    k_params, k_x = jax.random.split(key)
    params = init_params(k_params, dim_clip, dim_embedding,
                         prefix_length, clip_length, num_layers)
    x = jax.random.normal(k_x, (B, dim_clip), jnp.float32)

    kparams = prepare_kernel_params(params, num_heads)
    out = transformer_mapper_pallas(x, kparams, clip_length, prefix_length,
                                    dim_embedding, num_layers, num_heads)
    out = jax.block_until_ready(out)

    ref = transformer_mapper_ref(x, params, clip_length, dim_embedding, num_heads)
    np.testing.assert_allclose(np.asarray(out), np.asarray(ref),
                               rtol=2e-2, atol=2e-2)

    assert out.shape == (B, prefix_length, dim_embedding)
    print("KERNEL_OK")
</pallas_src>

<mosaic_0001>
module attributes {stable_mosaic.version = 11 : i64} {
  func.func @_mapper_kernel(%arg0: i32, %arg1: memref<1x1x64xf32, #tpu.memory_space<vmem>>, %arg2: memref<4x64xf32, #tpu.memory_space<vmem>>, %arg3: memref<64x256xbf16, #tpu.memory_space<vmem>>, %arg4: memref<1x256xf32, #tpu.memory_space<vmem>>, %arg5: memref<2x1x64xf32, #tpu.memory_space<vmem>>, %arg6: memref<2x1x64xf32, #tpu.memory_space<vmem>>, %arg7: memref<2x64x192xbf16, #tpu.memory_space<vmem>>, %arg8: memref<2x64x64xbf16, #tpu.memory_space<vmem>>, %arg9: memref<2x1x64xf32, #tpu.memory_space<vmem>>, %arg10: memref<2x1x64xf32, #tpu.memory_space<vmem>>, %arg11: memref<2x1x64xf32, #tpu.memory_space<vmem>>, %arg12: memref<2x64x128xbf16, #tpu.memory_space<vmem>>, %arg13: memref<2x1x128xf32, #tpu.memory_space<vmem>>, %arg14: memref<2x128x64xbf16, #tpu.memory_space<vmem>>, %arg15: memref<2x1x64xf32, #tpu.memory_space<vmem>>, %arg16: memref<1x4x64xf32, #tpu.memory_space<vmem>>) attributes {dimension_semantics = [#tpu.dimension_semantics<parallel>], iteration_bounds = array<i64: 2>, scalar_prefetch = 0 : i64, scratch_operands = 0 : i64, tpu.core_type = #tpu.core_type<tc>, window_params = [{transform_indices = @transform_0, window_bounds = array<i64: 1, 1, 64>}, {pipeline_mode = #tpu.pipeline_mode<synchronous>, transform_indices = @transform_1, window_bounds = array<i64: 4, 64>}, {pipeline_mode = #tpu.pipeline_mode<synchronous>, transform_indices = @transform_2, window_bounds = array<i64: 64, 256>}, {pipeline_mode = #tpu.pipeline_mode<synchronous>, transform_indices = @transform_3, window_bounds = array<i64: 1, 256>}, {pipeline_mode = #tpu.pipeline_mode<synchronous>, transform_indices = @transform_4, window_bounds = array<i64: 2, 1, 64>}, {pipeline_mode = #tpu.pipeline_mode<synchronous>, transform_indices = @transform_5, window_bounds = array<i64: 2, 1, 64>}, {pipeline_mode = #tpu.pipeline_mode<synchronous>, transform_indices = @transform_6, window_bounds = array<i64: 2, 64, 192>}, {pipeline_mode = #tpu.pipeline_mode<synchronous>, transform_indices = @transform_7, window_bounds = array<i64: 2, 64, 64>}, {pipeline_mode = #tpu.pipeline_mode<synchronous>, transform_indices = @transform_8, window_bounds = array<i64: 2, 1, 64>}, {pipeline_mode = #tpu.pipeline_mode<synchronous>, transform_indices = @transform_9, window_bounds = array<i64: 2, 1, 64>}, {pipeline_mode = #tpu.pipeline_mode<synchronous>, transform_indices = @transform_10, window_bounds = array<i64: 2, 1, 64>}, {pipeline_mode = #tpu.pipeline_mode<synchronous>, transform_indices = @transform_11, window_bounds = array<i64: 2, 64, 128>}, {pipeline_mode = #tpu.pipeline_mode<synchronous>, transform_indices = @transform_12, window_bounds = array<i64: 2, 1, 128>}, {pipeline_mode = #tpu.pipeline_mode<synchronous>, transform_indices = @transform_13, window_bounds = array<i64: 2, 128, 64>}, {pipeline_mode = #tpu.pipeline_mode<synchronous>, transform_indices = @transform_14, window_bounds = array<i64: 2, 1, 64>}, {transform_indices = @transform_15, window_bounds = array<i64: 1, 4, 64>}]} {
    %c0 = arith.constant 0 : index
    %c0_0 = arith.constant 0 : index
    %c0_1 = arith.constant 0 : index
    %0 = vector.load %arg1[%c0, %c0_0, %c0_1] : memref<1x1x64xf32, #tpu.memory_space<vmem>>, vector<1x1x64xf32>
    %1 = vector.shape_cast %0 : vector<1x1x64xf32> to vector<1x64xf32>
    %2 = arith.truncf %1 : vector<1x64xf32> to vector<1x64xbf16>
    %c0_2 = arith.constant 0 : index
    %c0_3 = arith.constant 0 : index
    %3 = vector.load %arg3[%c0_2, %c0_3] : memref<64x256xbf16, #tpu.memory_space<vmem>>, vector<64x256xbf16>
    %cst = arith.constant dense<0.000000e+00> : vector<1x256xf32>
    %4 = tpu.matmul %2, %3, %cst {dimension_numbers = #tpu.dot_dimension_numbers<[1], [0], [0], [1], [0, 0, 1, 1], [], []>} : vector<1x64xbf16>, vector<64x256xbf16>, vector<1x256xf32> -> vector<1x256xf32>
    %c0_4 = arith.constant 0 : index
    %c0_5 = arith.constant 0 : index
    %5 = vector.load %arg4[%c0_4, %c0_5] : memref<1x256xf32, #tpu.memory_space<vmem>>, vector<1x256xf32>
    %6 = arith.addf %4, %5 : vector<1x256xf32>
    %7 = vector.extract_strided_slice %6 {offsets = [0, 0], sizes = [1, 64], strides = [1, 1]} : vector<1x256xf32> to vector<1x64xf32>
    %8 = vector.extract_strided_slice %6 {offsets = [0, 64], sizes = [1, 64], strides = [1, 1]} : vector<1x256xf32> to vector<1x64xf32>
    %9 = vector.extract_strided_slice %6 {offsets = [0, 128], sizes = [1, 64], strides = [1, 1]} : vector<1x256xf32> to vector<1x64xf32>
    %10 = vector.extract_strided_slice %6 {offsets = [0, 192], sizes = [1, 64], strides = [1, 1]} : vector<1x256xf32> to vector<1x64xf32>
    %c0_6 = arith.constant 0 : index
    %c0_7 = arith.constant 0 : index
    %11 = vector.load %arg2[%c0_6, %c0_7] : memref<4x64xf32, #tpu.memory_space<vmem>>, vector<4x64xf32>
    %12 = tpu.concatenate %7, %8, %9, %10, %11 in 0 : vector<1x64xf32>, vector<1x64xf32>, vector<1x64xf32>, vector<1x64xf32>, vector<4x64xf32> -> vector<8x64xf32>
    %c0_8 = arith.constant 0 : index
    %c0_9 = arith.constant 0 : index
    %c0_10 = arith.constant 0 : index
    %13 = vector.load %arg5[%c0_8, %c0_9, %c0_10] : memref<2x1x64xf32, #tpu.memory_space<vmem>>, vector<1x1x64xf32>
    %14 = vector.shape_cast %13 : vector<1x1x64xf32> to vector<1x64xf32>
    %c0_11 = arith.constant 0 : index
    %c0_12 = arith.constant 0 : index
    %c0_13 = arith.constant 0 : index
    %15 = vector.load %arg6[%c0_11, %c0_12, %c0_13] : memref<2x1x64xf32, #tpu.memory_space<vmem>>, vector<1x1x64xf32>
    %16 = vector.shape_cast %15 : vector<1x1x64xf32> to vector<1x64xf32>
    %cst_14 = arith.constant dense<0.000000e+00> : vector<8xf32>
    %17 = vector.multi_reduction <add>, %12, %cst_14 [1] : vector<8x64xf32> to vector<8xf32>
    %18 = vector.shape_cast %17 : vector<8xf32> to vector<8x1xf32>
    %cst_15 = arith.constant 6.400000e+01 : f32
    %19 = vector.broadcast %cst_15 : f32 to vector<8x1xf32>
    %20 = arith.divf %18, %19 : vector<8x1xf32>
    %21 = arith.mulf %12, %12 : vector<8x64xf32>
    %cst_16 = arith.constant dense<0.000000e+00> : vector<8xf32>
    %22 = vector.multi_reduction <add>, %21, %cst_16 [1] : vector<8x64xf32> to vector<8xf32>
    %23 = vector.shape_cast %22 : vector<8xf32> to vector<8x1xf32>
    %cst_17 = arith.constant 6.400000e+01 : f32
    %24 = vector.broadcast %cst_17 : f32 to vector<8x1xf32>
    %25 = arith.divf %23, %24 : vector<8x1xf32>
    %26 = arith.mulf %20, %20 : vector<8x1xf32>
    %27 = arith.subf %25, %26 : vector<8x1xf32>
    %28 = vector.broadcast %20 : vector<8x1xf32> to vector<8x64xf32>
    %29 = arith.subf %12, %28 : vector<8x64xf32>
    %cst_18 = arith.constant 9.99999974E-6 : f32
    %30 = vector.broadcast %cst_18 : f32 to vector<8x1xf32>
    %31 = arith.addf %27, %30 : vector<8x1xf32>
    %32 = math.rsqrt %31 : vector<8x1xf32>
    %33 = vector.broadcast %32 : vector<8x1xf32> to vector<8x64xf32>
    %34 = arith.mulf %29, %33 : vector<8x64xf32>
    %35 = vector.broadcast %14 : vector<1x64xf32> to vector<8x64xf32>
    %36 = arith.mulf %34, %35 : vector<8x64xf32>
    %37 = vector.broadcast %16 : vector<1x64xf32> to vector<8x64xf32>
    %38 = arith.addf %36, %37 : vector<8x64xf32>
    %39 = arith.truncf %38 : vector<8x64xf32> to vector<8x64xbf16>
    %c0_19 = arith.constant 0 : index
    %c0_20 = arith.constant 0 : index
    %c0_21 = arith.constant 0 : index
    %40 = vector.load %arg7[%c0_19, %c0_20, %c0_21] : memref<2x64x192xbf16, #tpu.memory_space<vmem>>, vector<1x64x192xbf16>
    %41 = vector.shape_cast %40 : vector<1x64x192xbf16> to vector<64x192xbf16>
    %cst_22 = arith.constant dense<0.000000e+00> : vector<8x192xf32>
    %42 = tpu.matmul %39, %41, %cst_22 {dimension_numbers = #tpu.dot_dimension_numbers<[1], [0], [0], [1], [0, 0, 1, 1], [], []>} : vector<8x64xbf16>, vector<64x192xbf16>, vector<8x192xf32> -> vector<8x192xf32>
    %43 = vector.extract_strided_slice %42 {offsets = [0, 0], sizes = [8, 8], strides = [1, 1]} : vector<8x192xf32> to vector<8x8xf32>
    %44 = vector.extract_strided_slice %42 {offsets = [0, 8], sizes = [8, 8], strides = [1, 1]} : vector<8x192xf32> to vector<8x8xf32>
    %45 = vector.extract_strided_slice %42 {offsets = [0, 16], sizes = [8, 8], strides = [1, 1]} : vector<8x192xf32> to vector<8x8xf32>
    %46 = vector.extract_strided_slice %42 {offsets = [0, 24], sizes = [8, 8], strides = [1, 1]} : vector<8x192xf32> to vector<8x8xf32>
    %47 = vector.extract_strided_slice %42 {offsets = [0, 32], sizes = [8, 8], strides = [1, 1]} : vector<8x192xf32> to vector<8x8xf32>
    %48 = vector.extract_strided_slice %42 {offsets = [0, 40], sizes = [8, 8], strides = [1, 1]} : vector<8x192xf32> to vector<8x8xf32>
    %49 = vector.extract_strided_slice %42 {offsets = [0, 48], sizes = [8, 8], strides = [1, 1]} : vector<8x192xf32> to vector<8x8xf32>
    %50 = vector.extract_strided_slice %42 {offsets = [0, 56], sizes = [8, 8], strides = [1, 1]} : vector<8x192xf32> to vector<8x8xf32>
    %51 = vector.shape_cast %43 : vector<8x8xf32> to vector<1x8x8xf32>
    %52 = vector.shape_cast %44 : vector<8x8xf32> to vector<1x8x8xf32>
    %53 = vector.shape_cast %45 : vector<8x8xf32> to vector<1x8x8xf32>
    %54 = vector.shape_cast %46 : vector<8x8xf32> to vector<1x8x8xf32>
    %55 = vector.shape_cast %47 : vector<8x8xf32> to vector<1x8x8xf32>
    %56 = vector.shape_cast %48 : vector<8x8xf32> to vector<1x8x8xf32>
    %57 = vector.shape_cast %49 : vector<8x8xf32> to vector<1x8x8xf32>
    %58 = vector.shape_cast %50 : vector<8x8xf32> to vector<1x8x8xf32>
    %59 = tpu.concatenate %51, %52, %53, %54, %55, %56, %57, %58 in 0 : vector<1x8x8xf32>, vector<1x8x8xf32>, vector<1x8x8xf32>, vector<1x8x8xf32>, vector<1x8x8xf32>, vector<1x8x8xf32>, vector<1x8x8xf32>, vector<1x8x8xf32> -> vector<8x8x8xf32>
    %60 = vector.extract_strided_slice %42 {offsets = [0, 64], sizes = [8, 8], strides = [1, 1]} : vector<8x192xf32> to vector<8x8xf32>
    %61 = vector.extract_strided_slice %42 {offsets = [0, 72], sizes = [8, 8], strides = [1, 1]} : vector<8x192xf32> to vector<8x8xf32>
    %62 = vector.extract_strided_slice %42 {offsets = [0, 80], sizes = [8, 8], strides = [1, 1]} : vector<8x192xf32> to vector<8x8xf32>
    %63 = vector.extract_strided_slice %42 {offsets = [0, 88], sizes = [8, 8], strides = [1, 1]} : vector<8x192xf32> to vector<8x8xf32>
    %64 = vector.extract_strided_slice %42 {offsets = [0, 96], sizes = [8, 8], strides = [1, 1]} : vector<8x192xf32> to vector<8x8xf32>
    %65 = vector.extract_strided_slice %42 {offsets = [0, 104], sizes = [8, 8], strides = [1, 1]} : vector<8x192xf32> to vector<8x8xf32>
    %66 = vector.extract_strided_slice %42 {offsets = [0, 112], sizes = [8, 8], strides = [1, 1]} : vector<8x192xf32> to vector<8x8xf32>
    %67 = vector.extract_strided_slice %42 {offsets = [0, 120], sizes = [8, 8], strides = [1, 1]} : vector<8x192xf32> to vector<8x8xf32>
    %68 = vector.shape_cast %60 : vector<8x8xf32> to vector<1x8x8xf32>
    %69 = vector.shape_cast %61 : vector<8x8xf32> to vector<1x8x8xf32>
    %70 = vector.shape_cast %62 : vector<8x8xf32> to vector<1x8x8xf32>
    %71 = vector.shape_cast %63 : vector<8x8xf32> to vector<1x8x8xf32>
    %72 = vector.shape_cast %64 : vector<8x8xf32> to vector<1x8x8xf32>
    %73 = vector.shape_cast %65 : vector<8x8xf32> to vector<1x8x8xf32>
    %74 = vector.shape_cast %66 : vector<8x8xf32> to vector<1x8x8xf32>
    %75 = vector.shape_cast %67 : vector<8x8xf32> to vector<1x8x8xf32>
    %76 = tpu.concatenate %68, %69, %70, %71, %72, %73, %74, %75 in 0 : vector<1x8x8xf32>, vector<1x8x8xf32>, vector<1x8x8xf32>, vector<1x8x8xf32>, vector<1x8x8xf32>, vector<1x8x8xf32>, vector<1x8x8xf32>, vector<1x8x8xf32> -> vector<8x8x8xf32>
    %77 = vector.extract_strided_slice %42 {offsets = [0, 128], sizes = [8, 8], strides = [1, 1]} : vector<8x192xf32> to vector<8x8xf32>
    %78 = vector.extract_strided_slice %42 {offsets = [0, 136], sizes = [8, 8], strides = [1, 1]} : vector<8x192xf32> to vector<8x8xf32>
    %79 = vector.extract_strided_slice %42 {offsets = [0, 144], sizes = [8, 8], strides = [1, 1]} : vector<8x192xf32> to vector<8x8xf32>
    %80 = vector.extract_strided_slice %42 {offsets = [0, 152], sizes = [8, 8], strides = [1, 1]} : vector<8x192xf32> to vector<8x8xf32>
    %81 = vector.extract_strided_slice %42 {offsets = [0, 160], sizes = [8, 8], strides = [1, 1]} : vector<8x192xf32> to vector<8x8xf32>
    %82 = vector.extract_strided_slice %42 {offsets = [0, 168], sizes = [8, 8], strides = [1, 1]} : vector<8x192xf32> to vector<8x8xf32>
    %83 = vector.extract_strided_slice %42 {offsets = [0, 176], sizes = [8, 8], strides = [1, 1]} : vector<8x192xf32> to vector<8x8xf32>
    %84 = vector.extract_strided_slice %42 {offsets = [0, 184], sizes = [8, 8], strides = [1, 1]} : vector<8x192xf32> to vector<8x8xf32>
    %85 = vector.shape_cast %77 : vector<8x8xf32> to vector<1x8x8xf32>
    %86 = vector.shape_cast %78 : vector<8x8xf32> to vector<1x8x8xf32>
    %87 = vector.shape_cast %79 : vector<8x8xf32> to vector<1x8x8xf32>
    %88 = vector.shape_cast %80 : vector<8x8xf32> to vector<1x8x8xf32>
    %89 = vector.shape_cast %81 : vector<8x8xf32> to vector<1x8x8xf32>
    %90 = vector.shape_cast %82 : vector<8x8xf32> to vector<1x8x8xf32>
    %91 = vector.shape_cast %83 : vector<8x8xf32> to vector<1x8x8xf32>
    %92 = vector.shape_cast %84 : vector<8x8xf32> to vector<1x8x8xf32>
    %93 = tpu.concatenate %85, %86, %87, %88, %89, %90, %91, %92 in 0 : vector<1x8x8xf32>, vector<1x8x8xf32>, vector<1x8x8xf32>, vector<1x8x8xf32>, vector<1x8x8xf32>, vector<1x8x8xf32>, vector<1x8x8xf32>, vector<1x8x8xf32> -> vector<8x8x8xf32>
    %94 = arith.truncf %59 : vector<8x8x8xf32> to vector<8x8x8xbf16>
    %95 = arith.truncf %76 : vector<8x8x8xf32> to vector<8x8x8xbf16>
    "tpu.trace_start"() <{level = 10 : i32, message = "hnd,hmd->hnm"}> : () -> ()
    %cst_23 = arith.constant dense<0.000000e+00> : vector<8x8x8xf32>
    %96 = tpu.matmul %94, %95, %cst_23 {dimension_numbers = #tpu.dot_dimension_numbers<[2], [2], [1], [1], [0, 0, 0, 1, 1, 1], [0], [0]>} : vector<8x8x8xbf16>, vector<8x8x8xbf16>, vector<8x8x8xf32> -> vector<8x8x8xf32>
    "tpu.trace_stop"() : () -> ()
    %cst_24 = arith.constant dense<0xFF800000> : vector<8x8xf32>
    %97 = vector.multi_reduction <maximumf>, %96, %cst_24 [2] : vector<8x8x8xf32> to vector<8x8xf32>
    %98 = vector.shape_cast %97 : vector<8x8xf32> to vector<8x8x1xf32>
    %99 = vector.broadcast %98 : vector<8x8x1xf32> to vector<8x8x8xf32>
    %100 = arith.subf %96, %99 : vector<8x8x8xf32>
    %101 = math.exp %100 : vector<8x8x8xf32>
    %cst_25 = arith.constant dense<0.000000e+00> : vector<8x8xf32>
    %102 = vector.multi_reduction <add>, %101, %cst_25 [2] : vector<8x8x8xf32> to vector<8x8xf32>
    %103 = vector.shape_cast %102 : vector<8x8xf32> to vector<8x8x1xf32>
    %104 = tpu.reciprocal %103 {approx = true} : vector<8x8x1xf32> -> vector<8x8x1xf32>
    %105 = vector.broadcast %104 : vector<8x8x1xf32> to vector<8x8x8xf32>
    %106 = arith.mulf %101, %105 : vector<8x8x8xf32>
    %107 = arith.truncf %106 : vector<8x8x8xf32> to vector<8x8x8xbf16>
    %108 = arith.truncf %93 : vector<8x8x8xf32> to vector<8x8x8xbf16>
    "tpu.trace_start"() <{level = 10 : i32, message = "hnm,hmd->hnd"}> : () -> ()
    %cst_26 = arith.constant dense<0.000000e+00> : vector<8x8x8xf32>
    %109 = tpu.matmul %107, %108, %cst_26 {dimension_numbers = #tpu.dot_dimension_numbers<[2], [1], [1], [2], [0, 0, 0, 1, 1, 2], [0], [0]>} : vector<8x8x8xbf16>, vector<8x8x8xbf16>, vector<8x8x8xf32> -> vector<8x8x8xf32>
    "tpu.trace_stop"() : () -> ()
    %110 = vector.extract_strided_slice %109 {offsets = [0, 0, 0], sizes = [1, 8, 8], strides = [1, 1, 1]} : vector<8x8x8xf32> to vector<1x8x8xf32>
    %111 = vector.shape_cast %110 : vector<1x8x8xf32> to vector<8x8xf32>
    %112 = vector.extract_strided_slice %109 {offsets = [1, 0, 0], sizes = [1, 8, 8], strides = [1, 1, 1]} : vector<8x8x8xf32> to vector<1x8x8xf32>
    %113 = vector.shape_cast %112 : vector<1x8x8xf32> to vector<8x8xf32>
    %114 = vector.extract_strided_slice %109 {offsets = [2, 0, 0], sizes = [1, 8, 8], strides = [1, 1, 1]} : vector<8x8x8xf32> to vector<1x8x8xf32>
    %115 = vector.shape_cast %114 : vector<1x8x8xf32> to vector<8x8xf32>
    %116 = vector.extract_strided_slice %109 {offsets = [3, 0, 0], sizes = [1, 8, 8], strides = [1, 1, 1]} : vector<8x8x8xf32> to vector<1x8x8xf32>
    %117 = vector.shape_cast %116 : vector<1x8x8xf32> to vector<8x8xf32>
    %118 = vector.extract_strided_slice %109 {offsets = [4, 0, 0], sizes = [1, 8, 8], strides = [1, 1, 1]} : vector<8x8x8xf32> to vector<1x8x8xf32>
    %119 = vector.shape_cast %118 : vector<1x8x8xf32> to vector<8x8xf32>
    %120 = vector.extract_strided_slice %109 {offsets = [5, 0, 0], sizes = [1, 8, 8], strides = [1, 1, 1]} : vector<8x8x8xf32> to vector<1x8x8xf32>
    %121 = vector.shape_cast %120 : vector<1x8x8xf32> to vector<8x8xf32>
    %122 = vector.extract_strided_slice %109 {offsets = [6, 0, 0], sizes = [1, 8, 8], strides = [1, 1, 1]} : vector<8x8x8xf32> to vector<1x8x8xf32>
    %123 = vector.shape_cast %122 : vector<1x8x8xf32> to vector<8x8xf32>
    %124 = vector.extract_strided_slice %109 {offsets = [7, 0, 0], sizes = [1, 8, 8], strides = [1, 1, 1]} : vector<8x8x8xf32> to vector<1x8x8xf32>
    %125 = vector.shape_cast %124 : vector<1x8x8xf32> to vector<8x8xf32>
    %126 = tpu.concatenate %111, %113, %115, %117, %119, %121, %123, %125 in 1 : vector<8x8xf32>, vector<8x8xf32>, vector<8x8xf32>, vector<8x8xf32>, vector<8x8xf32>, vector<8x8xf32>, vector<8x8xf32>, vector<8x8xf32> -> vector<8x64xf32>
    %127 = arith.truncf %126 : vector<8x64xf32> to vector<8x64xbf16>
    %c0_27 = arith.constant 0 : index
    %c0_28 = arith.constant 0 : index
    %c0_29 = arith.constant 0 : index
    %128 = vector.load %arg8[%c0_27, %c0_28, %c0_29] : memref<2x64x64xbf16, #tpu.memory_space<vmem>>, vector<1x64x64xbf16>
    %129 = vector.shape_cast %128 : vector<1x64x64xbf16> to vector<64x64xbf16>
    %cst_30 = arith.constant dense<0.000000e+00> : vector<8x64xf32>
    %130 = tpu.matmul %127, %129, %cst_30 {dimension_numbers = #tpu.dot_dimension_numbers<[1], [0], [0], [1], [0, 0, 1, 1], [], []>} : vector<8x64xbf16>, vector<64x64xbf16>, vector<8x64xf32> -> vector<8x64xf32>
    %c0_31 = arith.constant 0 : index
    %c0_32 = arith.constant 0 : index
    %c0_33 = arith.constant 0 : index
    %131 = vector.load %arg9[%c0_31, %c0_32, %c0_33] : memref<2x1x64xf32, #tpu.memory_space<vmem>>, vector<1x1x64xf32>
    %132 = vector.shape_cast %131 : vector<1x1x64xf32> to vector<1x64xf32>
    %133 = vector.broadcast %132 : vector<1x64xf32> to vector<8x64xf32>
    %134 = arith.addf %130, %133 : vector<8x64xf32>
    %135 = arith.addf %12, %134 : vector<8x64xf32>
    %c0_34 = arith.constant 0 : index
    %c0_35 = arith.constant 0 : index
    %c0_36 = arith.constant 0 : index
    %136 = vector.load %arg10[%c0_34, %c0_35, %c0_36] : memref<2x1x64xf32, #tpu.memory_space<vmem>>, vector<1x1x64xf32>
    %137 = vector.shape_cast %136 : vector<1x1x64xf32> to vector<1x64xf32>
    %c0_37 = arith.constant 0 : index
    %c0_38 = arith.constant 0 : index
    %c0_39 = arith.constant 0 : index
    %138 = vector.load %arg11[%c0_37, %c0_38, %c0_39] : memref<2x1x64xf32, #tpu.memory_space<vmem>>, vector<1x1x64xf32>
    %139 = vector.shape_cast %138 : vector<1x1x64xf32> to vector<1x64xf32>
    %cst_40 = arith.constant dense<0.000000e+00> : vector<8xf32>
    %140 = vector.multi_reduction <add>, %135, %cst_40 [1] : vector<8x64xf32> to vector<8xf32>
    %141 = vector.shape_cast %140 : vector<8xf32> to vector<8x1xf32>
    %cst_41 = arith.constant 6.400000e+01 : f32
    %142 = vector.broadcast %cst_41 : f32 to vector<8x1xf32>
    %143 = arith.divf %141, %142 : vector<8x1xf32>
    %144 = arith.mulf %135, %135 : vector<8x64xf32>
    %cst_42 = arith.constant dense<0.000000e+00> : vector<8xf32>
    %145 = vector.multi_reduction <add>, %144, %cst_42 [1] : vector<8x64xf32> to vector<8xf32>
    %146 = vector.shape_cast %145 : vector<8xf32> to vector<8x1xf32>
    %cst_43 = arith.constant 6.400000e+01 : f32
    %147 = vector.broadcast %cst_43 : f32 to vector<8x1xf32>
    %148 = arith.divf %146, %147 : vector<8x1xf32>
    %149 = arith.mulf %143, %143 : vector<8x1xf32>
    %150 = arith.subf %148, %149 : vector<8x1xf32>
    %151 = vector.broadcast %143 : vector<8x1xf32> to vector<8x64xf32>
    %152 = arith.subf %135, %151 : vector<8x64xf32>
    %cst_44 = arith.constant 9.99999974E-6 : f32
    %153 = vector.broadcast %cst_44 : f32 to vector<8x1xf32>
    %154 = arith.addf %150, %153 : vector<8x1xf32>
    %155 = math.rsqrt %154 : vector<8x1xf32>
    %156 = vector.broadcast %155 : vector<8x1xf32> to vector<8x64xf32>
    %157 = arith.mulf %152, %156 : vector<8x64xf32>
    %158 = vector.broadcast %137 : vector<1x64xf32> to vector<8x64xf32>
    %159 = arith.mulf %157, %158 : vector<8x64xf32>
    %160 = vector.broadcast %139 : vector<1x64xf32> to vector<8x64xf32>
    %161 = arith.addf %159, %160 : vector<8x64xf32>
    %162 = arith.truncf %161 : vector<8x64xf32> to vector<8x64xbf16>
    %c0_45 = arith.constant 0 : index
    %c0_46 = arith.constant 0 : index
    %c0_47 = arith.constant 0 : index
    %163 = vector.load %arg12[%c0_45, %c0_46, %c0_47] : memref<2x64x128xbf16, #tpu.memory_space<vmem>>, vector<1x64x128xbf16>
    %164 = vector.shape_cast %163 : vector<1x64x128xbf16> to vector<64x128xbf16>
    %cst_48 = arith.constant dense<0.000000e+00> : vector<8x128xf32>
    %165 = tpu.matmul %162, %164, %cst_48 {dimension_numbers = #tpu.dot_dimension_numbers<[1], [0], [0], [1], [0, 0, 1, 1], [], []>} : vector<8x64xbf16>, vector<64x128xbf16>, vector<8x128xf32> -> vector<8x128xf32>
    %c0_49 = arith.constant 0 : index
    %c0_50 = arith.constant 0 : index
    %c0_51 = arith.constant 0 : index
    %166 = vector.load %arg13[%c0_49, %c0_50, %c0_51] : memref<2x1x128xf32, #tpu.memory_space<vmem>>, vector<1x1x128xf32>
    %167 = vector.shape_cast %166 : vector<1x1x128xf32> to vector<1x128xf32>
    %168 = vector.broadcast %167 : vector<1x128xf32> to vector<8x128xf32>
    %169 = arith.addf %165, %168 : vector<8x128xf32>
    %cst_52 = arith.constant 0.000000e+00 : f32
    %170 = vector.broadcast %cst_52 : f32 to vector<8x128xf32>
    %171 = arith.maximumf %169, %170 : vector<8x128xf32>
    %172 = arith.truncf %171 : vector<8x128xf32> to vector<8x128xbf16>
    %c0_53 = arith.constant 0 : index
    %c0_54 = arith.constant 0 : index
    %c0_55 = arith.constant 0 : index
    %173 = vector.load %arg14[%c0_53, %c0_54, %c0_55] : memref<2x128x64xbf16, #tpu.memory_space<vmem>>, vector<1x128x64xbf16>
    %174 = vector.shape_cast %173 : vector<1x128x64xbf16> to vector<128x64xbf16>
    %cst_56 = arith.constant dense<0.000000e+00> : vector<8x64xf32>
    %175 = tpu.matmul %172, %174, %cst_56 {dimension_numbers = #tpu.dot_dimension_numbers<[1], [0], [0], [1], [0, 0, 1, 1], [], []>} : vector<8x128xbf16>, vector<128x64xbf16>, vector<8x64xf32> -> vector<8x64xf32>
    %c0_57 = arith.constant 0 : index
    %c0_58 = arith.constant 0 : index
    %c0_59 = arith.constant 0 : index
    %176 = vector.load %arg15[%c0_57, %c0_58, %c0_59] : memref<2x1x64xf32, #tpu.memory_space<vmem>>, vector<1x1x64xf32>
    %177 = vector.shape_cast %176 : vector<1x1x64xf32> to vector<1x64xf32>
    %178 = vector.broadcast %177 : vector<1x64xf32> to vector<8x64xf32>
    %179 = arith.addf %175, %178 : vector<8x64xf32>
    %180 = arith.addf %135, %179 : vector<8x64xf32>
    %c1 = arith.constant 1 : index
    %c0_60 = arith.constant 0 : index
    %c0_61 = arith.constant 0 : index
    %181 = vector.load %arg5[%c1, %c0_60, %c0_61] : memref<2x1x64xf32, #tpu.memory_space<vmem>>, vector<1x1x64xf32>
    %182 = vector.shape_cast %181 : vector<1x1x64xf32> to vector<1x64xf32>
    %c1_62 = arith.constant 1 : index
    %c0_63 = arith.constant 0 : index
    %c0_64 = arith.constant 0 : index
    %183 = vector.load %arg6[%c1_62, %c0_63, %c0_64] : memref<2x1x64xf32, #tpu.memory_space<vmem>>, vector<1x1x64xf32>
    %184 = vector.shape_cast %183 : vector<1x1x64xf32> to vector<1x64xf32>
    %cst_65 = arith.constant dense<0.000000e+00> : vector<8xf32>
    %185 = vector.multi_reduction <add>, %180, %cst_65 [1] : vector<8x64xf32> to vector<8xf32>
    %186 = vector.shape_cast %185 : vector<8xf32> to vector<8x1xf32>
    %cst_66 = arith.constant 6.400000e+01 : f32
    %187 = vector.broadcast %cst_66 : f32 to vector<8x1xf32>
    %188 = arith.divf %186, %187 : vector<8x1xf32>
    %189 = arith.mulf %180, %180 : vector<8x64xf32>
    %cst_67 = arith.constant dense<0.000000e+00> : vector<8xf32>
    %190 = vector.multi_reduction <add>, %189, %cst_67 [1] : vector<8x64xf32> to vector<8xf32>
    %191 = vector.shape_cast %190 : vector<8xf32> to vector<8x1xf32>
    %cst_68 = arith.constant 6.400000e+01 : f32
    %192 = vector.broadcast %cst_68 : f32 to vector<8x1xf32>
    %193 = arith.divf %191, %192 : vector<8x1xf32>
    %194 = arith.mulf %188, %188 : vector<8x1xf32>
    %195 = arith.subf %193, %194 : vector<8x1xf32>
    %196 = vector.broadcast %188 : vector<8x1xf32> to vector<8x64xf32>
    %197 = arith.subf %180, %196 : vector<8x64xf32>
    %cst_69 = arith.constant 9.99999974E-6 : f32
    %198 = vector.broadcast %cst_69 : f32 to vector<8x1xf32>
    %199 = arith.addf %195, %198 : vector<8x1xf32>
    %200 = math.rsqrt %199 : vector<8x1xf32>
    %201 = vector.broadcast %200 : vector<8x1xf32> to vector<8x64xf32>
    %202 = arith.mulf %197, %201 : vector<8x64xf32>
    %203 = vector.broadcast %182 : vector<1x64xf32> to vector<8x64xf32>
    %204 = arith.mulf %202, %203 : vector<8x64xf32>
    %205 = vector.broadcast %184 : vector<1x64xf32> to vector<8x64xf32>
    %206 = arith.addf %204, %205 : vector<8x64xf32>
    %207 = arith.truncf %206 : vector<8x64xf32> to vector<8x64xbf16>
    %c1_70 = arith.constant 1 : index
    %c0_71 = arith.constant 0 : index
    %c0_72 = arith.constant 0 : index
    %208 = vector.load %arg7[%c1_70, %c0_71, %c0_72] : memref<2x64x192xbf16, #tpu.memory_space<vmem>>, vector<1x64x192xbf16>
    %209 = vector.shape_cast %208 : vector<1x64x192xbf16> to vector<64x192xbf16>
    %cst_73 = arith.constant dense<0.000000e+00> : vector<8x192xf32>
    %210 = tpu.matmul %207, %209, %cst_73 {dimension_numbers = #tpu.dot_dimension_numbers<[1], [0], [0], [1], [0, 0, 1, 1], [], []>} : vector<8x64xbf16>, vector<64x192xbf16>, vector<8x192xf32> -> vector<8x192xf32>
    %211 = vector.extract_strided_slice %210 {offsets = [0, 0], sizes = [8, 8], strides = [1, 1]} : vector<8x192xf32> to vector<8x8xf32>
    %212 = vector.extract_strided_slice %210 {offsets = [0, 8], sizes = [8, 8], strides = [1, 1]} : vector<8x192xf32> to vector<8x8xf32>
    %213 = vector.extract_strided_slice %210 {offsets = [0, 16], sizes = [8, 8], strides = [1, 1]} : vector<8x192xf32> to vector<8x8xf32>
    %214 = vector.extract_strided_slice %210 {offsets = [0, 24], sizes = [8, 8], strides = [1, 1]} : vector<8x192xf32> to vector<8x8xf32>
    %215 = vector.extract_strided_slice %210 {offsets = [0, 32], sizes = [8, 8], strides = [1, 1]} : vector<8x192xf32> to vector<8x8xf32>
    %216 = vector.extract_strided_slice %210 {offsets = [0, 40], sizes = [8, 8], strides = [1, 1]} : vector<8x192xf32> to vector<8x8xf32>
    %217 = vector.extract_strided_slice %210 {offsets = [0, 48], sizes = [8, 8], strides = [1, 1]} : vector<8x192xf32> to vector<8x8xf32>
    %218 = vector.extract_strided_slice %210 {offsets = [0, 56], sizes = [8, 8], strides = [1, 1]} : vector<8x192xf32> to vector<8x8xf32>
    %219 = vector.shape_cast %211 : vector<8x8xf32> to vector<1x8x8xf32>
    %220 = vector.shape_cast %212 : vector<8x8xf32> to vector<1x8x8xf32>
    %221 = vector.shape_cast %213 : vector<8x8xf32> to vector<1x8x8xf32>
    %222 = vector.shape_cast %214 : vector<8x8xf32> to vector<1x8x8xf32>
    %223 = vector.shape_cast %215 : vector<8x8xf32> to vector<1x8x8xf32>
    %224 = vector.shape_cast %216 : vector<8x8xf32> to vector<1x8x8xf32>
    %225 = vector.shape_cast %217 : vector<8x8xf32> to vector<1x8x8xf32>
    %226 = vector.shape_cast %218 : vector<8x8xf32> to vector<1x8x8xf32>
    %227 = tpu.concatenate %219, %220, %221, %222, %223, %224, %225, %226 in 0 : vector<1x8x8xf32>, vector<1x8x8xf32>, vector<1x8x8xf32>, vector<1x8x8xf32>, vector<1x8x8xf32>, vector<1x8x8xf32>, vector<1x8x8xf32>, vector<1x8x8xf32> -> vector<8x8x8xf32>
    %228 = vector.extract_strided_slice %210 {offsets = [0, 64], sizes = [8, 8], strides = [1, 1]} : vector<8x192xf32> to vector<8x8xf32>
    %229 = vector.extract_strided_slice %210 {offsets = [0, 72], sizes = [8, 8], strides = [1, 1]} : vector<8x192xf32> to vector<8x8xf32>
    %230 = vector.extract_strided_slice %210 {offsets = [0, 80], sizes = [8, 8], strides = [1, 1]} : vector<8x192xf32> to vector<8x8xf32>
    %231 = vector.extract_strided_slice %210 {offsets = [0, 88], sizes = [8, 8], strides = [1, 1]} : vector<8x192xf32> to vector<8x8xf32>
    %232 = vector.extract_strided_slice %210 {offsets = [0, 96], sizes = [8, 8], strides = [1, 1]} : vector<8x192xf32> to vector<8x8xf32>
    %233 = vector.extract_strided_slice %210 {offsets = [0, 104], sizes = [8, 8], strides = [1, 1]} : vector<8x192xf32> to vector<8x8xf32>
    %234 = vector.extract_strided_slice %210 {offsets = [0, 112], sizes = [8, 8], strides = [1, 1]} : vector<8x192xf32> to vector<8x8xf32>
    %235 = vector.extract_strided_slice %210 {offsets = [0, 120], sizes = [8, 8], strides = [1, 1]} : vector<8x192xf32> to vector<8x8xf32>
    %236 = vector.shape_cast %228 : vector<8x8xf32> to vector<1x8x8xf32>
    %237 = vector.shape_cast %229 : vector<8x8xf32> to vector<1x8x8xf32>
    %238 = vector.shape_cast %230 : vector<8x8xf32> to vector<1x8x8xf32>
    %239 = vector.shape_cast %231 : vector<8x8xf32> to vector<1x8x8xf32>
    %240 = vector.shape_cast %232 : vector<8x8xf32> to vector<1x8x8xf32>
    %241 = vector.shape_cast %233 : vector<8x8xf32> to vector<1x8x8xf32>
    %242 = vector.shape_cast %234 : vector<8x8xf32> to vector<1x8x8xf32>
    %243 = vector.shape_cast %235 : vector<8x8xf32> to vector<1x8x8xf32>
    %244 = tpu.concatenate %236, %237, %238, %239, %240, %241, %242, %243 in 0 : vector<1x8x8xf32>, vector<1x8x8xf32>, vector<1x8x8xf32>, vector<1x8x8xf32>, vector<1x8x8xf32>, vector<1x8x8xf32>, vector<1x8x8xf32>, vector<1x8x8xf32> -> vector<8x8x8xf32>
    %245 = vector.extract_strided_slice %210 {offsets = [0, 128], sizes = [8, 8], strides = [1, 1]} : vector<8x192xf32> to vector<8x8xf32>
    %246 = vector.extract_strided_slice %210 {offsets = [0, 136], sizes = [8, 8], strides = [1, 1]} : vector<8x192xf32> to vector<8x8xf32>
    %247 = vector.extract_strided_slice %210 {offsets = [0, 144], sizes = [8, 8], strides = [1, 1]} : vector<8x192xf32> to vector<8x8xf32>
    %248 = vector.extract_strided_slice %210 {offsets = [0, 152], sizes = [8, 8], strides = [1, 1]} : vector<8x192xf32> to vector<8x8xf32>
    %249 = vector.extract_strided_slice %210 {offsets = [0, 160], sizes = [8, 8], strides = [1, 1]} : vector<8x192xf32> to vector<8x8xf32>
    %250 = vector.extract_strided_slice %210 {offsets = [0, 168], sizes = [8, 8], strides = [1, 1]} : vector<8x192xf32> to vector<8x8xf32>
    %251 = vector.extract_strided_slice %210 {offsets = [0, 176], sizes = [8, 8], strides = [1, 1]} : vector<8x192xf32> to vector<8x8xf32>
    %252 = vector.extract_strided_slice %210 {offsets = [0, 184], sizes = [8, 8], strides = [1, 1]} : vector<8x192xf32> to vector<8x8xf32>
    %253 = vector.shape_cast %245 : vector<8x8xf32> to vector<1x8x8xf32>
    %254 = vector.shape_cast %246 : vector<8x8xf32> to vector<1x8x8xf32>
    %255 = vector.shape_cast %247 : vector<8x8xf32> to vector<1x8x8xf32>
    %256 = vector.shape_cast %248 : vector<8x8xf32> to vector<1x8x8xf32>
    %257 = vector.shape_cast %249 : vector<8x8xf32> to vector<1x8x8xf32>
    %258 = vector.shape_cast %250 : vector<8x8xf32> to vector<1x8x8xf32>
    %259 = vector.shape_cast %251 : vector<8x8xf32> to vector<1x8x8xf32>
    %260 = vector.shape_cast %252 : vector<8x8xf32> to vector<1x8x8xf32>
    %261 = tpu.concatenate %253, %254, %255, %256, %257, %258, %259, %260 in 0 : vector<1x8x8xf32>, vector<1x8x8xf32>, vector<1x8x8xf32>, vector<1x8x8xf32>, vector<1x8x8xf32>, vector<1x8x8xf32>, vector<1x8x8xf32>, vector<1x8x8xf32> -> vector<8x8x8xf32>
    %262 = arith.truncf %227 : vector<8x8x8xf32> to vector<8x8x8xbf16>
    %263 = arith.truncf %244 : vector<8x8x8xf32> to vector<8x8x8xbf16>
    "tpu.trace_start"() <{level = 10 : i32, message = "hnd,hmd->hnm"}> : () -> ()
    %cst_74 = arith.constant dense<0.000000e+00> : vector<8x8x8xf32>
    %264 = tpu.matmul %262, %263, %cst_74 {dimension_numbers = #tpu.dot_dimension_numbers<[2], [2], [1], [1], [0, 0, 0, 1, 1, 1], [0], [0]>} : vector<8x8x8xbf16>, vector<8x8x8xbf16>, vector<8x8x8xf32> -> vector<8x8x8xf32>
    "tpu.trace_stop"() : () -> ()
    %cst_75 = arith.constant dense<0xFF800000> : vector<8x8xf32>
    %265 = vector.multi_reduction <maximumf>, %264, %cst_75 [2] : vector<8x8x8xf32> to vector<8x8xf32>
    %266 = vector.shape_cast %265 : vector<8x8xf32> to vector<8x8x1xf32>
    %267 = vector.broadcast %266 : vector<8x8x1xf32> to vector<8x8x8xf32>
    %268 = arith.subf %264, %267 : vector<8x8x8xf32>
    %269 = math.exp %268 : vector<8x8x8xf32>
    %cst_76 = arith.constant dense<0.000000e+00> : vector<8x8xf32>
    %270 = vector.multi_reduction <add>, %269, %cst_76 [2] : vector<8x8x8xf32> to vector<8x8xf32>
    %271 = vector.shape_cast %270 : vector<8x8xf32> to vector<8x8x1xf32>
    %272 = tpu.reciprocal %271 {approx = true} : vector<8x8x1xf32> -> vector<8x8x1xf32>
    %273 = vector.broadcast %272 : vector<8x8x1xf32> to vector<8x8x8xf32>
    %274 = arith.mulf %269, %273 : vector<8x8x8xf32>
    %275 = arith.truncf %274 : vector<8x8x8xf32> to vector<8x8x8xbf16>
    %276 = arith.truncf %261 : vector<8x8x8xf32> to vector<8x8x8xbf16>
    "tpu.trace_start"() <{level = 10 : i32, message = "hnm,hmd->hnd"}> : () -> ()
    %cst_77 = arith.constant dense<0.000000e+00> : vector<8x8x8xf32>
    %277 = tpu.matmul %275, %276, %cst_77 {dimension_numbers = #tpu.dot_dimension_numbers<[2], [1], [1], [2], [0, 0, 0, 1, 1, 2], [0], [0]>} : vector<8x8x8xbf16>, vector<8x8x8xbf16>, vector<8x8x8xf32> -> vector<8x8x8xf32>
    "tpu.trace_stop"() : () -> ()
    %278 = vector.extract_strided_slice %277 {offsets = [0, 0, 0], sizes = [1, 8, 8], strides = [1, 1, 1]} : vector<8x8x8xf32> to vector<1x8x8xf32>
    %279 = vector.shape_cast %278 : vector<1x8x8xf32> to vector<8x8xf32>
    %280 = vector.extract_strided_slice %277 {offsets = [1, 0, 0], sizes = [1, 8, 8], strides = [1, 1, 1]} : vector<8x8x8xf32> to vector<1x8x8xf32>
    %281 = vector.shape_cast %280 : vector<1x8x8xf32> to vector<8x8xf32>
    %282 = vector.extract_strided_slice %277 {offsets = [2, 0, 0], sizes = [1, 8, 8], strides = [1, 1, 1]} : vector<8x8x8xf32> to vector<1x8x8xf32>
    %283 = vector.shape_cast %282 : vector<1x8x8xf32> to vector<8x8xf32>
    %284 = vector.extract_strided_slice %277 {offsets = [3, 0, 0], sizes = [1, 8, 8], strides = [1, 1, 1]} : vector<8x8x8xf32> to vector<1x8x8xf32>
    %285 = vector.shape_cast %284 : vector<1x8x8xf32> to vector<8x8xf32>
    %286 = vector.extract_strided_slice %277 {offsets = [4, 0, 0], sizes = [1, 8, 8], strides = [1, 1, 1]} : vector<8x8x8xf32> to vector<1x8x8xf32>
    %287 = vector.shape_cast %286 : vector<1x8x8xf32> to vector<8x8xf32>
    %288 = vector.extract_strided_slice %277 {offsets = [5, 0, 0], sizes = [1, 8, 8], strides = [1, 1, 1]} : vector<8x8x8xf32> to vector<1x8x8xf32>
    %289 = vector.shape_cast %288 : vector<1x8x8xf32> to vector<8x8xf32>
    %290 = vector.extract_strided_slice %277 {offsets = [6, 0, 0], sizes = [1, 8, 8], strides = [1, 1, 1]} : vector<8x8x8xf32> to vector<1x8x8xf32>
    %291 = vector.shape_cast %290 : vector<1x8x8xf32> to vector<8x8xf32>
    %292 = vector.extract_strided_slice %277 {offsets = [7, 0, 0], sizes = [1, 8, 8], strides = [1, 1, 1]} : vector<8x8x8xf32> to vector<1x8x8xf32>
    %293 = vector.shape_cast %292 : vector<1x8x8xf32> to vector<8x8xf32>
    %294 = tpu.concatenate %279, %281, %283, %285, %287, %289, %291, %293 in 1 : vector<8x8xf32>, vector<8x8xf32>, vector<8x8xf32>, vector<8x8xf32>, vector<8x8xf32>, vector<8x8xf32>, vector<8x8xf32>, vector<8x8xf32> -> vector<8x64xf32>
    %295 = arith.truncf %294 : vector<8x64xf32> to vector<8x64xbf16>
    %c1_78 = arith.constant 1 : index
    %c0_79 = arith.constant 0 : index
    %c0_80 = arith.constant 0 : index
    %296 = vector.load %arg8[%c1_78, %c0_79, %c0_80] : memref<2x64x64xbf16, #tpu.memory_space<vmem>>, vector<1x64x64xbf16>
    %297 = vector.shape_cast %296 : vector<1x64x64xbf16> to vector<64x64xbf16>
    %cst_81 = arith.constant dense<0.000000e+00> : vector<8x64xf32>
    %298 = tpu.matmul %295, %297, %cst_81 {dimension_numbers = #tpu.dot_dimension_numbers<[1], [0], [0], [1], [0, 0, 1, 1], [], []>} : vector<8x64xbf16>, vector<64x64xbf16>, vector<8x64xf32> -> vector<8x64xf32>
    %c1_82 = arith.constant 1 : index
    %c0_83 = arith.constant 0 : index
    %c0_84 = arith.constant 0 : index
    %299 = vector.load %arg9[%c1_82, %c0_83, %c0_84] : memref<2x1x64xf32, #tpu.memory_space<vmem>>, vector<1x1x64xf32>
    %300 = vector.shape_cast %299 : vector<1x1x64xf32> to vector<1x64xf32>
    %301 = vector.broadcast %300 : vector<1x64xf32> to vector<8x64xf32>
    %302 = arith.addf %298, %301 : vector<8x64xf32>
    %303 = arith.addf %180, %302 : vector<8x64xf32>
    %c1_85 = arith.constant 1 : index
    %c0_86 = arith.constant 0 : index
    %c0_87 = arith.constant 0 : index
    %304 = vector.load %arg10[%c1_85, %c0_86, %c0_87] : memref<2x1x64xf32, #tpu.memory_space<vmem>>, vector<1x1x64xf32>
    %305 = vector.shape_cast %304 : vector<1x1x64xf32> to vector<1x64xf32>
    %c1_88 = arith.constant 1 : index
    %c0_89 = arith.constant 0 : index
    %c0_90 = arith.constant 0 : index
    %306 = vector.load %arg11[%c1_88, %c0_89, %c0_90] : memref<2x1x64xf32, #tpu.memory_space<vmem>>, vector<1x1x64xf32>
    %307 = vector.shape_cast %306 : vector<1x1x64xf32> to vector<1x64xf32>
    %cst_91 = arith.constant dense<0.000000e+00> : vector<8xf32>
    %308 = vector.multi_reduction <add>, %303, %cst_91 [1] : vector<8x64xf32> to vector<8xf32>
    %309 = vector.shape_cast %308 : vector<8xf32> to vector<8x1xf32>
    %cst_92 = arith.constant 6.400000e+01 : f32
    %310 = vector.broadcast %cst_92 : f32 to vector<8x1xf32>
    %311 = arith.divf %309, %310 : vector<8x1xf32>
    %312 = arith.mulf %303, %303 : vector<8x64xf32>
    %cst_93 = arith.constant dense<0.000000e+00> : vector<8xf32>
    %313 = vector.multi_reduction <add>, %312, %cst_93 [1] : vector<8x64xf32> to vector<8xf32>
    %314 = vector.shape_cast %313 : vector<8xf32> to vector<8x1xf32>
    %cst_94 = arith.constant 6.400000e+01 : f32
    %315 = vector.broadcast %cst_94 : f32 to vector<8x1xf32>
    %316 = arith.divf %314, %315 : vector<8x1xf32>
    %317 = arith.mulf %311, %311 : vector<8x1xf32>
    %318 = arith.subf %316, %317 : vector<8x1xf32>
    %319 = vector.broadcast %311 : vector<8x1xf32> to vector<8x64xf32>
    %320 = arith.subf %303, %319 : vector<8x64xf32>
    %cst_95 = arith.constant 9.99999974E-6 : f32
    %321 = vector.broadcast %cst_95 : f32 to vector<8x1xf32>
    %322 = arith.addf %318, %321 : vector<8x1xf32>
    %323 = math.rsqrt %322 : vector<8x1xf32>
    %324 = vector.broadcast %323 : vector<8x1xf32> to vector<8x64xf32>
    %325 = arith.mulf %320, %324 : vector<8x64xf32>
    %326 = vector.broadcast %305 : vector<1x64xf32> to vector<8x64xf32>
    %327 = arith.mulf %325, %326 : vector<8x64xf32>
    %328 = vector.broadcast %307 : vector<1x64xf32> to vector<8x64xf32>
    %329 = arith.addf %327, %328 : vector<8x64xf32>
    %330 = arith.truncf %329 : vector<8x64xf32> to vector<8x64xbf16>
    %c1_96 = arith.constant 1 : index
    %c0_97 = arith.constant 0 : index
    %c0_98 = arith.constant 0 : index
    %331 = vector.load %arg12[%c1_96, %c0_97, %c0_98] : memref<2x64x128xbf16, #tpu.memory_space<vmem>>, vector<1x64x128xbf16>
    %332 = vector.shape_cast %331 : vector<1x64x128xbf16> to vector<64x128xbf16>
    %cst_99 = arith.constant dense<0.000000e+00> : vector<8x128xf32>
    %333 = tpu.matmul %330, %332, %cst_99 {dimension_numbers = #tpu.dot_dimension_numbers<[1], [0], [0], [1], [0, 0, 1, 1], [], []>} : vector<8x64xbf16>, vector<64x128xbf16>, vector<8x128xf32> -> vector<8x128xf32>
    %c1_100 = arith.constant 1 : index
    %c0_101 = arith.constant 0 : index
    %c0_102 = arith.constant 0 : index
    %334 = vector.load %arg13[%c1_100, %c0_101, %c0_102] : memref<2x1x128xf32, #tpu.memory_space<vmem>>, vector<1x1x128xf32>
    %335 = vector.shape_cast %334 : vector<1x1x128xf32> to vector<1x128xf32>
    %336 = vector.broadcast %335 : vector<1x128xf32> to vector<8x128xf32>
    %337 = arith.addf %333, %336 : vector<8x128xf32>
    %cst_103 = arith.constant 0.000000e+00 : f32
    %338 = vector.broadcast %cst_103 : f32 to vector<8x128xf32>
    %339 = arith.maximumf %337, %338 : vector<8x128xf32>
    %340 = arith.truncf %339 : vector<8x128xf32> to vector<8x128xbf16>
    %c1_104 = arith.constant 1 : index
    %c0_105 = arith.constant 0 : index
    %c0_106 = arith.constant 0 : index
    %341 = vector.load %arg14[%c1_104, %c0_105, %c0_106] : memref<2x128x64xbf16, #tpu.memory_space<vmem>>, vector<1x128x64xbf16>
    %342 = vector.shape_cast %341 : vector<1x128x64xbf16> to vector<128x64xbf16>
    %cst_107 = arith.constant dense<0.000000e+00> : vector<8x64xf32>
    %343 = tpu.matmul %340, %342, %cst_107 {dimension_numbers = #tpu.dot_dimension_numbers<[1], [0], [0], [1], [0, 0, 1, 1], [], []>} : vector<8x128xbf16>, vector<128x64xbf16>, vector<8x64xf32> -> vector<8x64xf32>
    %c1_108 = arith.constant 1 : index
    %c0_109 = arith.constant 0 : index
    %c0_110 = arith.constant 0 : index
    %344 = vector.load %arg15[%c1_108, %c0_109, %c0_110] : memref<2x1x64xf32, #tpu.memory_space<vmem>>, vector<1x1x64xf32>
    %345 = vector.shape_cast %344 : vector<1x1x64xf32> to vector<1x64xf32>
    %346 = vector.broadcast %345 : vector<1x64xf32> to vector<8x64xf32>
    %347 = arith.addf %343, %346 : vector<8x64xf32>
    %348 = arith.addf %303, %347 : vector<8x64xf32>
    %349 = vector.extract_strided_slice %348 {offsets = [4, 0], sizes = [4, 64], strides = [1, 1]} : vector<8x64xf32> to vector<4x64xf32>
    %c0_111 = arith.constant 0 : index
    %c0_112 = arith.constant 0 : index
    %c0_113 = arith.constant 0 : index
    %350 = vector.load %arg16[%c0_111, %c0_112, %c0_113] : memref<1x4x64xf32, #tpu.memory_space<vmem>>, vector<1x4x64xf32>
    %351 = vector.shape_cast %350 : vector<1x4x64xf32> to vector<4x64xf32>
    %352 = vector.shape_cast %349 : vector<4x64xf32> to vector<1x4x64xf32>
    tpu.vector_store %arg16[%c0_111, %c0_112, %c0_113], %352 {strides = array<i32>} : memref<1x4x64xf32, #tpu.memory_space<vmem>>, vector<1x4x64xf32>,
    return
  }
  func.func @transform_0(%arg0: i32) -> (i32, i32, i32) {
    %c0_i32 = arith.constant 0 : i32
    %c0_i32_0 = arith.constant 0 : i32
    %c0_i32_1 = arith.constant 0 : i32
    return %arg0, %c0_i32, %c0_i32_0 : i32, i32, i32
  }
  func.func @transform_1(%arg0: i32) -> (i32, i32) {
    %c0_i32 = arith.constant 0 : i32
    %c0_i32_0 = arith.constant 0 : i32
    %c0_i32_1 = arith.constant 0 : i32
    return %c0_i32, %c0_i32_0 : i32, i32
  }
  func.func @transform_2(%arg0: i32) -> (i32, i32) {
    %c0_i32 = arith.constant 0 : i32
    %c0_i32_0 = arith.constant 0 : i32
    %c0_i32_1 = arith.constant 0 : i32
    return %c0_i32, %c0_i32_0 : i32, i32
  }
  func.func @transform_3(%arg0: i32) -> (i32, i32) {
    %c0_i32 = arith.constant 0 : i32
    %c0_i32_0 = arith.constant 0 : i32
    %c0_i32_1 = arith.constant 0 : i32
    return %c0_i32, %c0_i32_0 : i32, i32
  }
  func.func @transform_4(%arg0: i32) -> (i32, i32, i32) {
    %c0_i32 = arith.constant 0 : i32
    %c0_i32_0 = arith.constant 0 : i32
    %c0_i32_1 = arith.constant 0 : i32
    %c0_i32_2 = arith.constant 0 : i32
    return %c0_i32, %c0_i32_0, %c0_i32_1 : i32, i32, i32
  }
  func.func @transform_5(%arg0: i32) -> (i32, i32, i32) {
    %c0_i32 = arith.constant 0 : i32
    %c0_i32_0 = arith.constant 0 : i32
    %c0_i32_1 = arith.constant 0 : i32
    %c0_i32_2 = arith.constant 0 : i32
    return %c0_i32, %c0_i32_0, %c0_i32_1 : i32, i32, i32
  }
  func.func @transform_6(%arg0: i32) -> (i32, i32, i32) {
    %c0_i32 = arith.constant 0 : i32
    %c0_i32_0 = arith.constant 0 : i32
    %c0_i32_1 = arith.constant 0 : i32
    %c0_i32_2 = arith.constant 0 : i32
    return %c0_i32, %c0_i32_0, %c0_i32_1 : i32, i32, i32
  }
  func.func @transform_7(%arg0: i32) -> (i32, i32, i32) {
    %c0_i32 = arith.constant 0 : i32
    %c0_i32_0 = arith.constant 0 : i32
    %c0_i32_1 = arith.constant 0 : i32
    %c0_i32_2 = arith.constant 0 : i32
    return %c0_i32, %c0_i32_0, %c0_i32_1 : i32, i32, i32
  }
  func.func @transform_8(%arg0: i32) -> (i32, i32, i32) {
    %c0_i32 = arith.constant 0 : i32
    %c0_i32_0 = arith.constant 0 : i32
    %c0_i32_1 = arith.constant 0 : i32
    %c0_i32_2 = arith.constant 0 : i32
    return %c0_i32, %c0_i32_0, %c0_i32_1 : i32, i32, i32
  }
  func.func @transform_9(%arg0: i32) -> (i32, i32, i32) {
    %c0_i32 = arith.constant 0 : i32
    %c0_i32_0 = arith.constant 0 : i32
    %c0_i32_1 = arith.constant 0 : i32
    %c0_i32_2 = arith.constant 0 : i32
    return %c0_i32, %c0_i32_0, %c0_i32_1 : i32, i32, i32
  }
  func.func @transform_10(%arg0: i32) -> (i32, i32, i32) {
    %c0_i32 = arith.constant 0 : i32
    %c0_i32_0 = arith.constant 0 : i32
    %c0_i32_1 = arith.constant 0 : i32
    %c0_i32_2 = arith.constant 0 : i32
    return %c0_i32, %c0_i32_0, %c0_i32_1 : i32, i32, i32
  }
  func.func @transform_11(%arg0: i32) -> (i32, i32, i32) {
    %c0_i32 = arith.constant 0 : i32
    %c0_i32_0 = arith.constant 0 : i32
    %c0_i32_1 = arith.constant 0 : i32
    %c0_i32_2 = arith.constant 0 : i32
    return %c0_i32, %c0_i32_0, %c0_i32_1 : i32, i32, i32
  }
  func.func @transform_12(%arg0: i32) -> (i32, i32, i32) {
    %c0_i32 = arith.constant 0 : i32
    %c0_i32_0 = arith.constant 0 : i32
    %c0_i32_1 = arith.constant 0 : i32
    %c0_i32_2 = arith.constant 0 : i32
    return %c0_i32, %c0_i32_0, %c0_i32_1 : i32, i32, i32
  }
  func.func @transform_13(%arg0: i32) -> (i32, i32, i32) {
    %c0_i32 = arith.constant 0 : i32
    %c0_i32_0 = arith.constant 0 : i32
    %c0_i32_1 = arith.constant 0 : i32
    %c0_i32_2 = arith.constant 0 : i32
    return %c0_i32, %c0_i32_0, %c0_i32_1 : i32, i32, i32
  }
  func.func @transform_14(%arg0: i32) -> (i32, i32, i32) {
    %c0_i32 = arith.constant 0 : i32
    %c0_i32_0 = arith.constant 0 : i32
    %c0_i32_1 = arith.constant 0 : i32
    %c0_i32_2 = arith.constant 0 : i32
    return %c0_i32, %c0_i32_0, %c0_i32_1 : i32, i32, i32
  }
  func.func @transform_15(%arg0: i32) -> (i32, i32, i32) {
    %c0_i32 = arith.constant 0 : i32
    %c0_i32_0 = arith.constant 0 : i32
    %c0_i32_1 = arith.constant 0 : i32
    return %arg0, %c0_i32, %c0_i32_0 : i32, i32, i32
  }
}

</mosaic_0001>

<bundles_post_ra>
// kernel: tpu_custom_call.1
= control target key start
LH: loop header
LB: loop body
LE: loop exit
PB: predicated region body
PF: predicated region fallthrough
CT: control target
= control target key end

     0   :  { %s5301_s0 = inlined_call_operand.vmem [shape: f32[2,1,64], index: 0, kind: input, shape index: {}]   ;;  %s5302_s1 = inlined_call_operand.vmem [shape: f32[4,64], index: 1, kind: input, shape index: {}]   ;;  %s5303_s2 = inlined_call_operand.vmem [shape: bf16[64,256], index: 2, kind: input, shape index: {}]   ;;  %s5304_s3 = inlined_call_operand.vmem [shape: f32[1,256], index: 3, kind: input, shape index: {}]   ;;  %s5305_s4 = inlined_call_operand.vmem [shape: f32[2,1,64], index: 4, kind: input, shape index: {}]   ;;  %s5306_s5 = inlined_call_operand.vmem [shape: f32[2,1,64], index: 5, kind: input, shape index: {}]   ;;  %s5307_s6 = inlined_call_operand.vmem [shape: bf16[2,64,192], index: 6, kind: input, shape index: {}]   ;;  %s5308_s7 = inlined_call_operand.hbm [shape: bf16[2,64,64], index: 7, kind: input, shape index: {}]   ;;  %s5309_s8 = inlined_call_operand.vmem [shape: f32[2,1,64], index: 8, kind: input, shape index: {}]   ;;  %s5310_s9 = inlined_call_operand.vmem [shape: f32[2,1,64], index: 9, kind: input, shape index: {}]   ;;  %s5311_s10 = inlined_call_operand.vmem [shape: f32[2,1,64], index: 10, kind: input, shape index: {}]   ;;  %s5312_s11 = inlined_call_operand.hbm [shape: bf16[2,64,128], index: 11, kind: input, shape index: {}]   ;;  %s5313_s12 = inlined_call_operand.vmem [shape: f32[2,1,128], index: 12, kind: input, shape index: {}]   ;;  %s5314_s13 = inlined_call_operand.vmem [shape: bf16[2,128,64], index: 13, kind: input, shape index: {}]   ;;  %s5315_s14 = inlined_call_operand.vmem [shape: f32[2,1,64], index: 14, kind: input, shape index: {}]   ;;  %s5316_s15 = inlined_call_operand.hbm [shape: f32[2,4,64], index: 15, kind: output, shape index: {}]  }
   0x1   :  { %5343 = sst [smem:[#allocation19_spill]] %s5316_s15 }
   0x2   :  { %20 = vsyncpa [#allocation3], 0 }
   0x3   :  { %21 = vsyncpa [#allocation6], 0 }
   0x4   :  { %22 = vsyncpa [#allocation4], 0 }
   0x5   :  { %24 = vsyncpa [#allocation4 + $0x1], 0  ;;  %s4522_s18 = smov 0   ;;  %s4524_s19 = smov 0  }
   0x6   :  { %s4526_s20 = smov 0   ;;  %s4528_s21 = smov 0  }
   0x7 LB: > { %5344 = sst [smem:[#allocation11_spill]] %s4405_s18  ;;  %s4543_s22 = sadd.s32 4294967295, %s4417_s21   ;;  %s4417_s21 = sphi %s4528_s21, %s5379_s21   ;;  %s4413_s20 = sphi %s4526_s20, %s5382_s20   ;;  %s4409_s19 = sphi %s4524_s19, %s5381_s19   ;;  %s4405_s18 = sphi %s4522_s18, %s5380_s18  }
   0x8   : > { %5345 = sst [smem:[#allocation12_spill]] %s4409_s19  ;;  %s3536_s23 = sadd.s32 4294967294, %s4417_s21  }
   0x9   : > { %5346 = sst [smem:[#allocation13_spill]] %s4413_s20  ;;  %s4547_s24 = sadd.s32 1, %s4417_s21  }
   0xa   : > { %5347 = sst [smem:[#allocation14_spill]] %s4417_s21  ;;  %s357_s25 = sadd.s32 1, %s4413_s20 }
   0xb   : > { %5348 = sst [smem:[#allocation15_spill]] %s4547_s24  ;;  %s354_s26 = ssub.s32 %s4417_s21, %s4547_s24 }
   0xc   : > { %p367_p0 = scmp.ne.s32.totalorder %s4413_s20, %s4409_s19  ;;  %p355_p1 = scmp.eq.s32.totalorder %s354_s26, 0 }
   0xd   : > { %p368_p2 = scmp.eq.s32.totalorder %s4543_s22, 1  ;;  %p373_p3 = scmp.ne.s32.totalorder %s4409_s19, %s4405_s18 }
   0xe   : > { %p374_p4 = scmp.eq.s32.totalorder %s3536_s23, 1  ;;  %p3537_p7 = scmp.ge.s32.totalorder %s4417_s21, 1 }
   0xf   : > { %s4558_s27 = scalar_select %p355_p1, %s4413_s20, %s357_s25  }
  0x10   : > { %p4560_p5 = por %p368_p2, %p367_p0  ;;  %p4564_p6 = por %p374_p4, %p373_p3 }
  0x11   : > { %5349 = sst [smem:[#allocation16_spill]] %s4558_s27  ;;  %p381_p8 = scmp.lt.s32.totalorder %s4417_s21, 3 }
  0x12   : > { %s5350_s28 = scalar_select %p4560_p5, 1, 0 }
  0x13   : > { %s5352_s29 = scalar_select %p4564_p6, 1, 0 }
  0x14   : > { %5351 = sst [smem:[#allocation17_spill]] %s5350_s28  ;;  %p5323_p9 = scmp.eq.s32.totalorder %s4543_s22, 0 }
  0x15   : > { %5353 = sst [smem:[#allocation18_spill]] %s5352_s29  ;;  %p4571_p10 = pnand %p3537_p7, %p381_p8 }
  0x16   : > { %s4419_s16 = smov [#allocation2]   ;;  %s4420_s25 = smov [#allocation5]  }
  0x17   : > { %s5354_s30 = scalar_select %p4571_p10, 1, 0 }
  0x18   : > { %s411_s17 = sshll.u32 %s4419_s16, 4  ;;  %p4081_p11 = pneg %p4571_p10  ;;  %s412_s17 = int_to_ptr.vmem [resolvable:$true] %s411_s17 }
  0x19   : > { %s433_s26 = sshll.u32 %s4420_s25, 4  ;;  %s4291_s24 = scalar_lea.hbm %s5308_s7, 1024  ;;  %s4583_s26 = int_to_ptr.vmem [resolvable:$true] %s433_s26 }
  0x1a   : > { %p4579_p12 = pnand %p5323_p9, %p4081_p11  ;;  %p4292_p13 = scmp.ne.s32.totalorder %s5308_s7, %s4291_s24 }
  0x1b   : > { %p4298_p3 = scmp.lt.u32.totalorder %s4291_s24, %s5308_s7 }
  0x1c   : > { %p4293_p0 = pneg %p4579_p12 }
  0x1e   : > { %p4294_p1 = pnand %p4293_p0, %p4292_p13 }
  0x20   : > { %p4295_p2 = pneg %p4294_p1 }
  0x22   : > { %p4300_p4 = pnand %p4298_p3, %p4295_p2 }
  0x24   : > { %4303 = shalt.err (!%p4300_p4)
}
  0x25   : > { %s4304_s25 = scalar_lea.vmem %s412_s17, 1024  ;;  %p4312_p9 = scmp.lt.s32.totalorder %s412_s17, %s412_s17 }
  0x26   : > { %p4305_p7 = scmp.ne.s32.totalorder %s412_s17, %s4304_s25  ;;  %p4313_p6 = scmp.lt.s32.totalorder %s4304_s25, %s4304_s25 }
  0x28   : > { %p4307_p8 = pnand %p4305_p7, %p4293_p0  ;;  %p4314_p5 = por %p4313_p6, %p4312_p9 }
  0x2a   : > { %p4308_p11 = pneg %p4307_p8 }
  0x2c   : > { %p4315_p10 = pnand %p4314_p5, %p4308_p11 }
  0x2e   : > { %4318 = shalt.err (!%p4315_p10)
}
  0x2f   : > { %s4421_s20 = smov 64   ;;  %s4422_s27 = smov 4  }
  0x30   : > { %4084 = dma.hbm_to_vmem [thread:$0]  (!%p4579_p12), %s5308_s7, 1024, %s412_s17, [#allocation3], %s4421_s20, %s4421_s20, %s4422_s27  }
  0x31   : > { %s4319_s16 = scalar_lea.hbm %s5312_s11, 1024 }
  0x32   : > { %p4320_p13 = scmp.ne.s32.totalorder %s5312_s11, %s4319_s16  ;;  %p4326_p9 = scmp.lt.u32.totalorder %s4319_s16, %s5312_s11 }
  0x34   : > { %p4322_p5 = pnand %p4320_p13, %p4293_p0 }
  0x36   : > { %p4323_p6 = pneg %p4322_p5 }
  0x38   : > { %p4328_p10 = pnand %p4326_p9, %p4323_p6 }
  0x3a   : > { %4331 = shalt.err (!%p4328_p10)
}
  0x3b   : > { %s4332_s17 = scalar_lea.vmem %s4583_s26, 1024  ;;  %p4340_p4 = scmp.lt.s32.totalorder %s4583_s26, %s4583_s26 }
  0x3c   : > { %p4333_p1 = scmp.ne.s32.totalorder %s4583_s26, %s4332_s17  ;;  %p4341_p7 = scmp.lt.s32.totalorder %s4332_s17, %s4332_s17 }
  0x3e   : > { %p4335_p2 = pnand %p4333_p1, %p4293_p0  ;;  %p4342_p8 = por %p4341_p7, %p4340_p4 }
  0x40   : > { %p4336_p3 = pneg %p4335_p2 }
  0x42   : > { %p4343_p11 = pnand %p4342_p8, %p4336_p3 }
  0x44   : > { %4346 = shalt.err (!%p4343_p11)
}
  0x45   : > { %4087 = dma.hbm_to_vmem [thread:$0]  (!%p4579_p12), %s5312_s11, 1024, %s4583_s26, [#allocation6], %s4421_s20, %s4421_s20, %s4422_s27  }
  0x46   : > { %p5356_p13 = scmp.ne.s32.totalorder %s5354_s30, 0 }
  0x47   : > { %p5357_p5 = scmp.eq.s32.totalorder (!%p5356_p13), %s4543_s22, 0 }
  0x48   : > { %464 = sbr.rel (%p5356_p13) target bundleno = 5150 (0x141e), region = 80 }
  0x4f   : > { %4392 = dma.done.wait (%p5357_p5), [#allocation3], 1024   ;;  %p5358_p0 = pmov %p5357_p5 }
  0x51   : > { %4394 = vsyncadd (%p5358_p0), [#allocation3], 4294966272  ;;  %p5359_p6 = pmov %p5358_p0 }
  0x52   : > { %p5360_p9 = pmov %p5358_p0 }
  0x53   : > { %4396 = dma.done.wait (%p5359_p6), [#allocation6], 1024  }
  0x54   : > { %4398 = vsyncadd (%p5360_p9), [#allocation6], 4294966272  ;;  %v4423_v0 = vmov 0   ;;  %p514_p12 = scmp.lt.s32.totalorder %s4543_s22, 1  ;;  %v4151_v1 = vld [vmem:[%s5303_s2 + $0x4] ss:$8 sps:$4 sm:$0xff]   ;;  %v570_v11 = vlaneseq }
  0x55   : > { %616 = vmatprep.mubr.bf16.mxu1 %v4423_v0  ;;  %v4153_v2 = vld [vmem:[%s5303_s2] ss:$8 sps:$4 sm:$0xff]   ;;  %584 = vmatprep.subr.bf16.mxu1 %v4151_v1  ;;  %v4154_v3 = vld [vmem:[%s5303_s2 + $0x14] ss:$8 sps:$4 sm:$0xff]   ;;  %v4156_v4 = vld [vmem:[%s5303_s2 + $0x10] ss:$8 sps:$4 sm:$0xff]  }
  0x56   : > { %s515_s18 = scalar_select %p514_p12, %s4543_s22, 1  ;;  %585 = vmatpush1.bf16.msra.mxu1 %v4153_v2  ;;  %v4157_v5 = vld [vmem:[%s5303_s2 + $0x24] ss:$8 sps:$4 sm:$0xff]   ;;  %v4159_v6 = vld [vmem:[%s5303_s2 + $0x20] ss:$8 sps:$4 sm:$0xff]   ;;  %vm580_vm0 = vcmask 523264  }
  0x57   : > { %586 = vmatprep.subr.bf16.mxu1 %v4154_v3  ;;  %v4160_v7 = vld [vmem:[%s5303_s2 + $0x34] ss:$8 sps:$4 sm:$0xff]   ;;  %v4162_v8 = vld [vmem:[%s5303_s2 + $0x30] ss:$8 sps:$4 sm:$0xff]   ;;  %v571_v12 = vshrl.u32 %v570_v11, 7  ;;  %s5337_s21 = smov 64  }
  0x58   : > { %s516_s23 = scalar_lea.vmem %s5301_s0, %s515_s18  ;;  %v528_v14 = vld [vmem:[%s5304_s3] sm:$0x3]  ;;  %vm641_vm1 = vcmask 1040384   ;;  %vm643_vm2 = vcmask 1041408   ;;  %vm645_vm3 = vcmask 1042432   ;;  %vm647_vm4 = vcmask 1043456  }
  0x59   : > { %v518_v9 = vld [vmem:[%s516_s23] sm:$0x1]  ;;  %v572_v13 = vsub.s32 0, %v571_v12  ;;  %v576_v15 = vsub.s32 1, %v571_v12  ;;  %v4165_v38 = vld [vmem:[%s5307_s6 + $0x4] ss:$8 sps:$4 sm:$0xff]  }
  0x5a   : > { %587 = vmatpush1.bf16.msra.mxu1 %v4156_v4  ;;  %v519_v10 = vpack.c.bf16 %v518_v9, %v518_v9  ;;  %v625_v26 = vld [vmem:[%s5302_s1] sm:$0xf]  ;;  %v4168_v40 = vld [vmem:[%s5307_s6 + $0x14] ss:$8 sps:$4 sm:$0xff]   ;;  %v4166_v41 = vld [vmem:[%s5307_s6 + $0x10] ss:$8 sps:$4 sm:$0xff]  }
  0x5b   : > { %588 = vmatprep.subr.bf16.mxu1 %v4157_v5  ;;  %v573_v16 = vrot.slane %v528_v14, %v572_v13  ;;  %v577_v17 = vrot.slane %v528_v14, %v576_v15  ;;  %v639_v30 = vrot.slane %v625_v26, 4  ;;  %v4163_v39 = vld [vmem:[%s5307_s6] ss:$8 sps:$4 sm:$0xff]   ;;  %v4171_v42 = vld [vmem:[%s5307_s6 + $0x24] ss:$8 sps:$4 sm:$0xff]   ;;  %s4425_s30 = smov 112  }
  0x5c   : > { %v4169_v43 = vld [vmem:[%s5307_s6 + $0x20] ss:$8 sps:$4 sm:$0xff]   ;;  %v4174_v44 = vld [vmem:[%s5307_s6 + $0x34] ss:$8 sps:$4 sm:$0xff]   ;;  %v4172_v45 = vld [vmem:[%s5307_s6 + $0x30] ss:$8 sps:$4 sm:$0xff]  }
  0x5d   : > { %v3554_v55 = vld [vmem:[%s5305_s4] ss:$0 sm:$0xff]  ;;  %s4426_s23 = smov 120   ;;  %s4427_s26 = smov 72   ;;  %v4429_v2 = vmov 0.0   ;;  %vm4431_vm5 = vmmov 0  }
  0x5e   : > { %589 = vmatpush1.bf16.msra.mxu1 %v4159_v6  ;;  %v3555_v57 = vld [vmem:[%s5306_s5] ss:$0 sm:$0xff]  ;;  %s4428_s20 = smov 104   ;;  %3791 = vmatprep.subr.bf16.mxu0 %v4429_v2  ;;  %s5341_s27 = smov 96   ;;  %vm829_vm6 = vcmask 64512   ;;  %vm1720_vm7 = vcmask 130048  }
  0x5f   : > { %590 = vmatprep.subr.bf16.mxu1 %v4160_v7  ;;  %3793 = vmatprep.mubr.msk.bf16.mxu0 %vm4431_vm5, %v4429_v2  ;;  %s4432_s18 = smov 88   ;;  %s5339_s24 = smov 80   ;;  %vm1722_vm8 = vcmask 195584   ;;  %vm1724_vm9 = vcmask 261120   ;;  %vm1726_vm10 = vcmask 326656   ;;  %vm1728_vm11 = vcmask 392192  }
  0x60   : > { %s5335_s29 = smov 16   ;;  %s5336_s16 = smov 8   ;;  %vm1730_vm12 = vcmask 457728   ;;  %vm3442_vm13 = vcmask 523268  }
  0x61   : > { %s5333_s25 = smov 32   ;;  %s5334_s17 = smov 24  }
  0x62   : > { %591 = vmatpush1.bf16.msra.mxu1 %v4162_v8  ;;  %s5332_s15 = smov 40   ;;  %s5331_s19 = smov 48  }
  0x63   : > { %733 = vmatprep.subr.bf16.mxu1 %v4165_v38  ;;  %s5330_s28 = smov 56  }
  0x65   : > { %3553 = vmatmul.mubr.msk.bf16.vlgmr.msra.gmra.mrb[0].mxu1 %vm580_vm0, %v519_v10 }
  0x66   : > { %765 = vmatprep.mubr.bf16.mxu1 %v4423_v0  ;;  %734 = vmatpush1.bf16.msra.mxu1 %v4163_v39 }
  0x67   : > { %735 = vmatprep.subr.bf16.mxu1 %v4168_v40 }
  0x6a   : > { %736 = vmatpush1.bf16.msra.mxu1 %v4166_v41 }
  0x6b   : > { %737 = vmatprep.subr.bf16.mxu1 %v4171_v42 }
  0x6e   : > { %738 = vmatpush1.bf16.msra.mxu1 %v4169_v43 }
  0x6f   : > { %739 = vmatprep.subr.bf16.mxu1 %v4174_v44 }
  0x72   : > { %740 = vmatpush1.bf16.msra.mxu1 %v4172_v45 }
  0x73   : > { %3797 = vmatprep.subr.bf16.mxu1 %v4429_v2 }
 0x138   : > { %v618_v18 = vpop.f32.mrb[0].mxu1 }
 0x139   : > { %v619_v19 = vadd.f32 %v618_v18, %v573_v16  ;;  %v620_v20 = vpop.f32.mrb[1].mxu1 }
 0x13a   : > { %v622_v21 = vpop.f32.mrb[2].mxu1  ;;  %v621_v22 = vadd.f32 %v620_v20, %v577_v17 }
 0x13b   : > { %v623_v23 = vpop.f32.mrb[3].mxu1  ;;  %v627_v24 = vrot.slane %v619_v19, 7 }
 0x13c   : > { %v634_v25 = vrot.slane %v621_v22, 5  ;;  %v632_v29 = vrot.slane %v621_v22, 6 }
 0x13d   : > { %628 = vrot.lane.b32.xlu0 %v627_v24, %s5337_s21 }
 0x141   : > { %635 = vrot.lane.b32.xlu0 %v634_v25, %s5337_s21 }
 0x1af   : > { %v629_v27 = vpop.permute.xlu0 %628 }
 0x1b0   : > { %v642_v28 = vsel %vm641_vm1, %v619_v19, %v629_v27 }
 0x1b1   : > { %v644_v31 = vsel %vm643_vm2, %v642_v28, %v632_v29 }
 0x1b3   : > { %v636_v32 = vpop.permute.xlu0 %635 }
 0x1b4   : > { %v646_v33 = vsel %vm645_vm3, %v644_v31, %v636_v32 }
 0x1b5   : > { %v4683_v34 = vsel %vm647_vm4, %v646_v33, %v639_v30 }
 0x1b6   : > { %v651_v35 = vsel %vm580_vm0, %v4683_v34, 0.0  ;;  %v656_v36 = vmul.f32 %v4683_v34, %v4683_v34 }
 0x1b7   : > { %652 = vadd.xlane.f32.xlu1 %v651_v35 }
 0x1b8   : > { %v657_v37 = vsel %vm580_vm0, %v656_v36, 0.0 }
 0x1bb   : > { %658 = vadd.xlane.f32.xlu1 %v657_v37 }
 0x244   : > { %v653_v46 = vpop.xlane.xlu1 %652 }
 0x245   : > { %v655_v47 = vmul.f32 0.015625, %v653_v46 }
 0x247   : > { %v661_v49 = vmul.f32 %v655_v47, %v655_v47  ;;  %v663_v53 = vsub.f32 %v4683_v34, %v655_v47 }
 0x248   : > { %v659_v48 = vpop.xlane.xlu1 %658 }
 0x249   : > { %v660_v50 = vmul.f32 0.015625, %v659_v48 }
 0x24b   : > { %v662_v51 = vsub.f32 %v660_v50, %v661_v49 }
 0x24d   : > { %v664_v52 = vadd.f32 1e-05, %v662_v51 }
 0x24f   : > { %4219 = vrsqrt.f32 %v664_v52 }
 0x259   : > { %v4220_v54 = vpop.eup %4219 }
 0x25a   : > { %v666_v56 = vmul.f32 %v4220_v54, %v663_v53 }
 0x25c   : > { %v673_v58 = vmul.f32 %v3554_v55, %v666_v56 }
 0x25e   : > { %v680_v59 = vadd.f32 %v3555_v57, %v673_v58 }
 0x260   : > { %v681_v60 = vpack.c.bf16 %v680_v59, %v680_v59 }
 0x262   : > { %3564 = vmatmul.mubr.msk.bf16.vlgmr.msra.gmra.mrb[4].mxu1 %vm580_vm0, %v681_v60 }
 0x263   : > { %3799 = vmatprep.mubr.msk.bf16.mxu1 %vm4431_vm5, %v4429_v2 }
 0x335   : > { %v767_v61 = vpop.f32.mrb[4].mxu1 }
 0x336   : > { %778 = vrot.lane.b32.xlu1 %v767_v61, %s4425_s30  ;;  %775 = vrot.lane.b32.xlu0 %v767_v61, %s4426_s23  ;;  %v4724_v62 = vpop.f32.mrb[5].mxu1  ;;  %v818_v3 = vpack.c.bf16 %v767_v61, %v767_v61 }
 0x337   : > { %v771_v63 = vpop.f32.mrb[6].mxu1  ;;  %v1315_v32 = vpack.c.bf16 %v4724_v62, %v4724_v62 }
 0x338   : > { %v772_v1 = vpop.f32.mrb[7].mxu1 }
 0x339   : > { %v1327_v36 = vsel %vm647_vm4, %v1315_v32, 0 }
 0x33a   : > { %793 = vrot.lane.b32.xlu1 %v767_v61, %s4427_s26  ;;  %781 = vrot.lane.b32.xlu0 %v767_v61, %s4428_s20 }
 0x33e   : > { %784 = vrot.lane.b32.xlu0 %v767_v61, %s5341_s27 }
 0x342   : > { %787 = vrot.lane.b32.xlu0 %v767_v61, %s4432_s18 }
 0x346   : > { %790 = vrot.lane.b32.xlu0 %v767_v61, %s5339_s24 }
 0x34a   : > { %827 = vrot.lane.b32.xlu0 %v818_v3, %s5337_s21 }
 0x3a8   : > { %v779_v4 = vpop.permute.xlu1 %778  ;;  %v776_v5 = vpop.permute.xlu0 %775 }
 0x3a9   : > { %v820_v6 = vpack.c.bf16 %v779_v4, %v779_v4  ;;  %v819_v7 = vpack.c.bf16 %v776_v5, %v776_v5 }
 0x3ab   : > { %877 = vrot.lane.b32.xlu1 %v819_v7, %s5337_s21  ;;  %926 = vrot.lane.b32.xlu0 %v820_v6, %s5337_s21 }
 0x3ac   : > { %v782_v8 = vpop.permute.xlu0 %781  ;;  %v794_v14 = vpop.permute.xlu1 %793 }
 0x3ad   : > { %v821_v9 = vpack.c.bf16 %v782_v8, %v782_v8  ;;  %v825_v16 = vpack.c.bf16 %v794_v14, %v794_v14 }
 0x3af   : > { %975 = vrot.lane.b32.xlu1 %v821_v9, %s5337_s21 }
 0x3b0   : > { %v785_v10 = vpop.permute.xlu0 %784 }
 0x3b1   : > { %v822_v11 = vpack.c.bf16 %v785_v10, %v785_v10 }
 0x3b3   : > { %1024 = vrot.lane.b32.xlu0 %v822_v11, %s5337_s21 }
 0x3b4   : > { %v788_v12 = vpop.permute.xlu0 %787 }
 0x3b5   : > { %v823_v13 = vpack.c.bf16 %v788_v12, %v788_v12 }
 0x3b7   : > { %1073 = vrot.lane.b32.xlu1 %v823_v13, %s5337_s21 }
 0x3b8   : > { %v791_v15 = vpop.permute.xlu0 %790 }
 0x3b9   : > { %v824_v17 = vpack.c.bf16 %v791_v15, %v791_v15 }
 0x3bb   : > { %1171 = vrot.lane.b32.xlu1 %v825_v16, %s5337_s21  ;;  %1122 = vrot.lane.b32.xlu0 %v824_v17, %s5337_s21  ;;  %s5370_s21 = smov 56  }
 0x3bc   : > { %v828_v18 = vpop.permute.xlu0 %827 }
 0x3bd   : > { %v834_v19 = vsel %vm829_vm6, %v828_v18, 0 }
 0x3be   : > { %3792 = vmatpush3.bf16.xpose.msra.mxu0 %v834_v19 }
 0x3bf   : > { %3803 = vmatprep.subr.bf16.mxu0 %v4429_v2 }
 0x3c5   : > { %3794 = vmatmul.mubr.msk.bf16.vlgmr.msra.gmra.mrb[0].mxu0 %vm829_vm6, %v818_v3 }
 0x3c6   : > { %3805 = vmatprep.mubr.msk.bf16.mxu0 %vm4431_vm5, %v4429_v2 }
 0x41d   : > { %v878_v20 = vpop.permute.xlu1 %877  ;;  %v927_v21 = vpop.permute.xlu0 %926 }
 0x41e   : > { %v883_v22 = vsel %vm829_vm6, %v878_v20, 0  ;;  %v932_v23 = vsel %vm829_vm6, %v927_v21, 0 }
 0x41f   : > { %3798 = vmatpush3.bf16.xpose.msra.mxu1 %v883_v22  ;;  %3804 = vmatpush3.bf16.xpose.msra.mxu0 %v932_v23 }
 0x420   : > { %3809 = vmatprep.subr.bf16.mxu1 %v4429_v2  ;;  %3815 = vmatprep.subr.bf16.mxu0 %v4429_v2 }
 0x421   : > { %v976_v24 = vpop.permute.xlu1 %975 }
 0x422   : > { %v981_v26 = vsel %vm829_vm6, %v976_v24, 0 }
 0x425   : > { %v1025_v25 = vpop.permute.xlu0 %1024 }
 0x426   : > { %v1030_v27 = vsel %vm829_vm6, %v1025_v25, 0  ;;  %3800 = vmatmul.mubr.msk.bf16.vlgmr.msra.gmra.mrb[8].mxu1 %vm829_vm6, %v819_v7  ;;  %3806 = vmatmul.mubr.msk.bf16.vlgmr.msra.gmra.mrb[4].mxu0 %vm829_vm6, %v820_v6 }
 0x427   : > { %3810 = vmatpush3.bf16.xpose.msra.mxu1 %v981_v26  ;;  %3816 = vmatpush3.bf16.xpose.msra.mxu0 %v1030_v27 }
 0x428   : > { %3811 = vmatprep.mubr.msk.bf16.mxu1 %vm4431_vm5, %v4429_v2  ;;  %3817 = vmatprep.mubr.msk.bf16.mxu0 %vm4431_vm5, %v4429_v2 }
 0x429   : > { %3821 = vmatprep.subr.bf16.mxu1 %v4429_v2  ;;  %3827 = vmatprep.subr.bf16.mxu0 %v4429_v2  ;;  %v1074_v28 = vpop.permute.xlu1 %1073 }
 0x42a   : > { %v1079_v30 = vsel %vm829_vm6, %v1074_v28, 0 }
 0x42d   : > { %v1123_v29 = vpop.permute.xlu0 %1122  ;;  %v1172_v33 = vpop.permute.xlu1 %1171 }
 0x42e   : > { %v1128_v31 = vsel %vm829_vm6, %v1123_v29, 0  ;;  %3812 = vmatmul.mubr.msk.bf16.vlgmr.msra.gmra.mrb[12].mxu1 %vm829_vm6, %v821_v9  ;;  %3818 = vmatmul.mubr.msk.bf16.vlgmr.msra.gmra.mrb[8].mxu0 %vm829_vm6, %v822_v11  ;;  %v1177_v35 = vsel %vm829_vm6, %v1172_v33, 0 }
 0x42f   : > { %3822 = vmatpush3.bf16.xpose.msra.mxu1 %v1079_v30  ;;  %3828 = vmatpush3.bf16.xpose.msra.mxu0 %v1128_v31 }
 0x430   : > { %3823 = vmatprep.mubr.msk.bf16.mxu1 %vm4431_vm5, %v4429_v2  ;;  %3829 = vmatprep.mubr.msk.bf16.mxu0 %vm4431_vm5, %v4429_v2 }
 0x431   : > { %3833 = vmatprep.subr.bf16.mxu1 %v4429_v2  ;;  %3839 = vmatprep.subr.bf16.mxu0 %v4429_v2 }
 0x436   : > { %3824 = vmatmul.mubr.msk.bf16.vlgmr.msra.gmra.mrb[16].mxu1 %vm829_vm6, %v823_v13  ;;  %3830 = vmatmul.mubr.msk.bf16.vlgmr.msra.gmra.mrb[12].mxu0 %vm829_vm6, %v824_v17 }
 0x437   : > { %3834 = vmatpush3.bf16.xpose.msra.mxu1 %v1177_v35  ;;  %3840 = vmatpush3.bf16.msra.mxu0 %v1327_v36 }
 0x438   : > { %3835 = vmatprep.mubr.msk.bf16.mxu1 %vm4431_vm5, %v4429_v2  ;;  %3845 = vmatprep.subr.bf16.mxu1 %v4429_v2 }
 0x439   : > { %3841 = vmatprep.mubr.msk.bf16.mxu0 %vm4431_vm5, %v4429_v2  ;;  %3851 = vmatprep.subr.bf16.mxu0 %v4429_v2 }
 0x43e   : > { %3836 = vmatmul.mubr.msk.bf16.vlgmr.msra.gmra.mrb[20].mxu1 %vm829_vm6, %v825_v16 }
 0x43f   : > { %3847 = vmatprep.mubr.msk.bf16.mxu1 %vm4431_vm5, %v4429_v2 }
 0x498   : > { %v870_v37 = vpop.f32.mrb[0].mxu0 }
 0x499   : > { %v3795_v38 = vpop.f32.mrb[1].mxu0  ;;  %v1219_v39 = vsel %vm829_vm6, %v870_v37, -inf }
 0x49a   : > { %1220 = vmax.xlane.f32.xlu0 %v1219_v39  ;;  %v873_v40 = vpop.f32.mrb[2].mxu0 }
 0x49b   : > { %v3796_v41 = vpop.f32.mrb[3].mxu0 }
 0x4f9   : > { %v919_v42 = vpop.f32.mrb[8].mxu1  ;;  %v968_v43 = vpop.f32.mrb[4].mxu0 }
 0x4fa   : > { %v3801_v44 = vpop.f32.mrb[9].mxu1  ;;  %v3807_v45 = vpop.f32.mrb[5].mxu0  ;;  %v1225_v46 = vsel %vm829_vm6, %v968_v43, -inf  ;;  %v1222_v47 = vsel %vm829_vm6, %v919_v42, -inf }
 0x4fb   : > { %1226 = vmax.xlane.f32.xlu0 %v1225_v46  ;;  %v971_v48 = vpop.f32.mrb[6].mxu0  ;;  %1223 = vmax.xlane.f32.xlu1 %v1222_v47  ;;  %v922_v49 = vpop.f32.mrb[10].mxu1 }
 0x4fc   : > { %v3802_v50 = vpop.f32.mrb[11].mxu1  ;;  %v3808_v51 = vpop.f32.mrb[7].mxu0 }
 0x501   : > { %v1017_v52 = vpop.f32.mrb[12].mxu1  ;;  %v1066_v53 = vpop.f32.mrb[8].mxu0 }
 0x502   : > { %v3813_v54 = vpop.f32.mrb[13].mxu1  ;;  %v3819_v55 = vpop.f32.mrb[9].mxu0  ;;  %v1231_v56 = vsel %vm829_vm6, %v1066_v53, -inf  ;;  %v1228_v57 = vsel %vm829_vm6, %v1017_v52, -inf }
 0x503   : > { %v1069_v58 = vpop.f32.mrb[10].mxu0  ;;  %1232 = vmax.xlane.f32.xlu1 %v1231_v56  ;;  %1229 = vmax.xlane.f32.xlu0 %v1228_v57  ;;  %v1020_v59 = vpop.f32.mrb[14].mxu1 }
 0x504   : > { %v3814_v60 = vpop.f32.mrb[15].mxu1  ;;  %v3820_v61 = vpop.f32.mrb[11].mxu0 }
 0x509   : > { %v1115_v63 = vpop.f32.mrb[16].mxu1  ;;  %v1164_v1 = vpop.f32.mrb[12].mxu0 }
 0x50a   : > { %v3825_v3 = vpop.f32.mrb[17].mxu1  ;;  %v3831_v4 = vpop.f32.mrb[13].mxu0  ;;  %v1237_v5 = vsel %vm829_vm6, %v1164_v1, -inf  ;;  %v1234_v6 = vsel %vm829_vm6, %v1115_v63, -inf }
 0x50b   : > { %v1167_v7 = vpop.f32.mrb[14].mxu0  ;;  %1238 = vmax.xlane.f32.xlu1 %v1237_v5  ;;  %1235 = vmax.xlane.f32.xlu0 %v1234_v6  ;;  %v1118_v8 = vpop.f32.mrb[18].mxu1 }
 0x50c   : > { %v3826_v9 = vpop.f32.mrb[19].mxu1  ;;  %v3832_v10 = vpop.f32.mrb[15].mxu0 }
 0x511   : > { %v1213_v11 = vpop.f32.mrb[20].mxu1 }
 0x512   : > { %v3837_v12 = vpop.f32.mrb[21].mxu1  ;;  %v1240_v13 = vsel %vm829_vm6, %v1213_v11, -inf }
 0x513   : > { %1241 = vmax.xlane.f32.xlu0 %v1240_v13  ;;  %v1216_v14 = vpop.f32.mrb[22].mxu1 }
 0x514   : > { %v3838_v15 = vpop.f32.mrb[23].mxu1 }
 0x51c   : > { %797 = vrot.lane.b32.xlu1 %v4724_v62, %s4426_s23 }
 0x520   : > { %803 = vrot.lane.b32.xlu1 %v4724_v62, %s4428_s20 }
 0x524   : > { %806 = vrot.lane.b32.xlu1 %v4724_v62, %s5341_s27 }
 0x527   : > { %v1221_v16 = vpop.xlane.xlu0 %1220 }
 0x528   : > { %v1243_v17 = vsub.f32 %v870_v37, %v1221_v16 }
 0x529   : > { %800 = vrot.lane.b32.xlu0 %v4724_v62, %s4425_s30 }
 0x52a   : > { %v1251_v18 = vmul.f32 1.442695, %v1243_v17 }
 0x52c   : > { %4221 = vpow2.f32 %v1251_v18 }
 0x536   : > { %v4805_v19 = vpop.eup %4221 }
 0x537   : > { %v1267_v20 = vsel %vm829_vm6, %v4805_v19, 0.0 }
 0x548   : > { %1268 = vadd.xlane.f32.xlu1 %v1267_v20 }
 0x559   : > { %809 = vrot.lane.b32.xlu1 %v4724_v62, %s4432_s18 }
 0x588   : > { %v1227_v21 = vpop.xlane.xlu0 %1226  ;;  %v1224_v22 = vpop.xlane.xlu1 %1223 }
 0x589   : > { %v1245_v23 = vsub.f32 %v968_v43, %v1227_v21  ;;  %v1244_v24 = vsub.f32 %v919_v42, %v1224_v22 }
 0x58b   : > { %v1255_v25 = vmul.f32 1.442695, %v1245_v23  ;;  %v1253_v26 = vmul.f32 1.442695, %v1244_v24 }
 0x58d   : > { %4223 = vpow2.f32 %v1255_v25 }
 0x58e   : > { %4225 = vpow2.f32 %v1253_v26 }
 0x590   : > { %v1233_v27 = vpop.xlane.xlu1 %1232  ;;  %v1230_v28 = vpop.xlane.xlu0 %1229 }
 0x591   : > { %v1247_v29 = vsub.f32 %v1066_v53, %v1233_v27  ;;  %v1246_v30 = vsub.f32 %v1017_v52, %v1230_v28 }
 0x593   : > { %v1259_v31 = vmul.f32 1.442695, %v1247_v29  ;;  %v1257_v32 = vmul.f32 1.442695, %v1246_v30 }
 0x595   : > { %4227 = vpow2.f32 %v1259_v31 }
 0x596   : > { %4229 = vpow2.f32 %v1257_v32 }
 0x597   : > { %v4811_v33 = vpop.eup %4223 }
 0x598   : > { %v4813_v35 = vpop.eup %4225  ;;  %v1239_v36 = vpop.xlane.xlu1 %1238  ;;  %v1273_v38 = vsel %vm829_vm6, %v4811_v33, 0.0 }
 0x599   : > { %v1236_v37 = vpop.xlane.xlu0 %1235  ;;  %v1249_v39 = vsub.f32 %v1164_v1, %v1239_v36  ;;  %1274 = vadd.xlane.f32.xlu1 %v1273_v38  ;;  %v1270_v41 = vsel %vm829_vm6, %v4813_v35, 0.0 }
 0x59a   : > { %v1248_v40 = vsub.f32 %v1115_v63, %v1236_v37  ;;  %1271 = vadd.xlane.f32.xlu0 %v1270_v41 }
 0x59b   : > { %v1263_v43 = vmul.f32 1.442695, %v1249_v39 }
 0x59c   : > { %v1261_v42 = vmul.f32 1.442695, %v1248_v40  ;;  %v798_v44 = vpop.permute.xlu1 %797 }
 0x59d   : > { %v1316_v45 = vpack.c.bf16 %v798_v44, %v798_v44 }
 0x59e   : > { %4231 = vpow2.f32 %v1261_v42 }
 0x59f   : > { %v4819_v46 = vpop.eup %4227  ;;  %v1373_v47 = vsel %vm647_vm4, %v1316_v45, 0  ;;  %4233 = vpow2.f32 %v1263_v43 }
 0x5a0   : > { %v4822_v48 = vpop.eup %4229  ;;  %3846 = vmatpush3.bf16.msra.mxu1 %v1373_v47  ;;  %v1242_v49 = vpop.xlane.xlu0 %1241  ;;  %v1279_v50 = vsel %vm829_vm6, %v4819_v46, 0.0 }
 0x5a1   : > { %v1250_v51 = vsub.f32 %v1213_v11, %v1242_v49  ;;  %1280 = vadd.xlane.f32.xlu1 %v1279_v50  ;;  %v1276_v52 = vsel %vm829_vm6, %v4822_v48, 0.0  ;;  %3857 = vmatprep.subr.bf16.mxu1 %v4429_v2  ;;  %v804_v60 = vpop.permute.xlu1 %803 }
 0x5a2   : > { %1277 = vadd.xlane.f32.xlu0 %v1276_v52  ;;  %v1318_v16 = vpack.c.bf16 %v804_v60, %v804_v60 }
 0x5a3   : > { %v1265_v53 = vmul.f32 1.442695, %v1250_v51 }
 0x5a4   : > { %v801_v1 = vpop.permute.xlu0 %800  ;;  %v1465_v21 = vsel %vm647_vm4, %v1318_v16, 0 }
 0x5a5   : > { %4235 = vpow2.f32 %v1265_v53  ;;  %v807_v61 = vpop.permute.xlu1 %806  ;;  %v1317_v4 = vpack.c.bf16 %v801_v1, %v801_v1  ;;  %v4175_v53 = vld [vmem:[#allocation2] sm:$0xff]  }
 0x5a6   : > { %v1319_v14 = vpack.c.bf16 %v807_v61, %v807_v61 }
 0x5a7   : > { %v1419_v7 = vsel %vm647_vm4, %v1317_v4, 0 }
 0x5a8   : > { %v4829_v54 = vpop.eup %4231  ;;  %v1511_v20 = vsel %vm647_vm4, %v1319_v14, 0 }
 0x5a9   : > { %v1282_v55 = vsel %vm829_vm6, %v4829_v54, 0.0  ;;  %v4833_v56 = vpop.eup %4233 }
 0x5aa   : > { %1283 = vadd.xlane.f32.xlu0 %v1282_v55  ;;  %v1285_v57 = vsel %vm829_vm6, %v4833_v56, 0.0 }
 0x5ae   : > { %1286 = vadd.xlane.f32.xlu0 %v1285_v57 }
 0x5af   : > { %v4837_v58 = vpop.eup %4235 }
 0x5b0   : > { %v1288_v59 = vsel %vm829_vm6, %v4837_v58, 0.0 }
 0x5b2   : > { %1289 = vadd.xlane.f32.xlu0 %v1288_v59  ;;  %812 = vrot.lane.b32.xlu1 %v4724_v62, %s5339_s24 }
 0x5c8   : > { %815 = vrot.lane.b32.xlu0 %v4724_v62, %s4427_s26 }
 0x5d5   : > { %v1269_v63 = vpop.xlane.xlu1 %1268 }
 0x5d6   : > { %4237 = vrcp.f32 %v1269_v63  ;;  %v4176_v63 = vld [vmem:[#allocation2 + $0x8] sm:$0xff]  }
 0x5d9   : > { %v810_v62 = vpop.permute.xlu1 %809 }
 0x5da   : > { %v1320_v28 = vpack.c.bf16 %v810_v62, %v810_v62 }
 0x5e0   : > { %v4238_v3 = vpop.eup %4237 }
 0x5e1   : > { %v1299_v5 = vmul.f32 %v4238_v3, %v4805_v19  ;;  %v4177_v3 = vld [vmem:[#allocation2 + $0x10] sm:$0xff]  }
 0x5e3   : > { %v1307_v6 = vpack.c.bf16 %v1299_v5, %v1299_v5 }
 0x5e5   : > { %3842 = vmatmul.mubr.msk.bf16.vlgmr.msra.gmra.mrb[16].mxu0 %vm829_vm6, %v1307_v6 }
 0x5e6   : > { %3852 = vmatpush3.bf16.msra.mxu0 %v1419_v7  ;;  %3853 = vmatprep.mubr.msk.bf16.mxu0 %vm4431_vm5, %v4429_v2 }
 0x5e7   : > { %3863 = vmatprep.subr.bf16.mxu0 %v4429_v2 }
 0x626   : > { %v1275_v8 = vpop.xlane.xlu1 %1274 }
 0x627   : > { %4239 = vrcp.f32 %v1275_v8  ;;  %v1272_v9 = vpop.xlane.xlu0 %1271 }
 0x628   : > { %4241 = vrcp.f32 %v1272_v9 }
 0x62e   : > { %v1281_v10 = vpop.xlane.xlu1 %1280 }
 0x62f   : > { %4243 = vrcp.f32 %v1281_v10  ;;  %v1278_v11 = vpop.xlane.xlu0 %1277  ;;  %v4178_v10 = vld [vmem:[#allocation2 + $0x18] sm:$0xff]  }
 0x630   : > { %4245 = vrcp.f32 %v1278_v11 }
 0x631   : > { %v4240_v12 = vpop.eup %4239 }
 0x632   : > { %v4242_v13 = vpop.eup %4241  ;;  %v1301_v15 = vmul.f32 %v4240_v12, %v4811_v33  ;;  %v813_v22 = vpop.permute.xlu1 %812 }
 0x633   : > { %v1300_v17 = vmul.f32 %v4242_v13, %v4813_v35  ;;  %v1321_v27 = vpack.c.bf16 %v813_v22, %v813_v22  ;;  %v1557_v35 = vsel %vm647_vm4, %v1320_v28, 0 }
 0x634   : > { %v1309_v18 = vpack.c.bf16 %v1301_v15, %v1301_v15 }
 0x635   : > { %v1308_v19 = vpack.c.bf16 %v1300_v17, %v1300_v17  ;;  %v1603_v33 = vsel %vm647_vm4, %v1321_v27, 0 }
 0x636   : > { %3854 = vmatmul.mubr.msk.bf16.vlgmr.msra.gmra.mrb[20].mxu0 %vm829_vm6, %v1309_v18 }
 0x637   : > { %3848 = vmatmul.mubr.msk.bf16.vlgmr.msra.gmra.mrb[24].mxu1 %vm829_vm6, %v1308_v19  ;;  %3864 = vmatpush3.bf16.msra.mxu0 %v1511_v20  ;;  %v1284_v23 = vpop.xlane.xlu0 %1283 }
 0x638   : > { %3858 = vmatpush3.bf16.msra.mxu1 %v1465_v21  ;;  %4247 = vrcp.f32 %v1284_v23  ;;  %3859 = vmatprep.mubr.msk.bf16.mxu1 %vm4431_vm5, %v4429_v2 }
 0x639   : > { %v4244_v24 = vpop.eup %4243  ;;  %3865 = vmatprep.mubr.msk.bf16.mxu0 %vm4431_vm5, %v4429_v2  ;;  %3869 = vmatprep.subr.bf16.mxu1 %v4429_v2 }
 0x63a   : > { %v4246_v25 = vpop.eup %4245  ;;  %v1303_v26 = vmul.f32 %v4244_v24, %v4819_v46  ;;  %3875 = vmatprep.subr.bf16.mxu0 %v4429_v2 }
 0x63b   : > { %v1302_v29 = vmul.f32 %v4246_v25, %v4822_v48  ;;  %v1287_v30 = vpop.xlane.xlu0 %1286 }
 0x63c   : > { %4249 = vrcp.f32 %v1287_v30  ;;  %v1311_v31 = vpack.c.bf16 %v1303_v26, %v1303_v26 }
 0x63d   : > { %v1310_v32 = vpack.c.bf16 %v1302_v29, %v1302_v29 }
 0x63e   : > { %3866 = vmatmul.mubr.msk.bf16.vlgmr.msra.gmra.mrb[24].mxu0 %vm829_vm6, %v1311_v31 }
 0x63f   : > { %3860 = vmatmul.mubr.msk.bf16.vlgmr.msra.gmra.mrb[28].mxu1 %vm829_vm6, %v1310_v32  ;;  %3876 = vmatpush3.bf16.msra.mxu0 %v1603_v33  ;;  %v1290_v36 = vpop.xlane.xlu0 %1289 }
 0x640   : > { %3870 = vmatpush3.bf16.msra.mxu1 %v1557_v35  ;;  %4251 = vrcp.f32 %v1290_v36  ;;  %3871 = vmatprep.mubr.msk.bf16.mxu1 %vm4431_vm5, %v4429_v2 }
 0x641   : > { %3881 = vmatprep.subr.bf16.mxu1 %v4429_v2  ;;  %3877 = vmatprep.mubr.msk.bf16.mxu0 %vm4431_vm5, %v4429_v2 }
 0x642   : > { %v4248_v37 = vpop.eup %4247  ;;  %3887 = vmatprep.subr.bf16.mxu0 %v4429_v2 }
 0x643   : > { %v1304_v38 = vmul.f32 %v4248_v37, %v4829_v54  ;;  %v816_v39 = vpop.permute.xlu0 %815 }
 0x644   : > { %v1322_v40 = vpack.c.bf16 %v816_v39, %v816_v39  ;;  %v3581_v39 = vld [vmem:[%s5309_s8] ss:$0 sm:$0xff] }
 0x645   : > { %v1312_v41 = vpack.c.bf16 %v1304_v38, %v1304_v38 }
 0x646   : > { %v4250_v42 = vpop.eup %4249  ;;  %v1649_v43 = vsel %vm647_vm4, %v1322_v40, 0 }
 0x647   : > { %v1305_v44 = vmul.f32 %v4250_v42, %v4833_v56  ;;  %3872 = vmatmul.mubr.msk.bf16.vlgmr.msra.gmra.mrb[32].mxu1 %vm829_vm6, %v1312_v41 }
 0x648   : > { %3882 = vmatpush3.bf16.msra.mxu1 %v1649_v43  ;;  %3883 = vmatprep.mubr.msk.bf16.mxu1 %vm4431_vm5, %v4429_v2 }
 0x649   : > { %v1313_v45 = vpack.c.bf16 %v1305_v44, %v1305_v44  ;;  %3899 = vmatprep.subr.bf16.mxu1 %v4429_v2 }
 0x64a   : > { %v4252_v46 = vpop.eup %4251 }
 0x64b   : > { %v1306_v47 = vmul.f32 %v4252_v46, %v4837_v58  ;;  %3878 = vmatmul.mubr.msk.bf16.vlgmr.msra.gmra.mrb[28].mxu0 %vm829_vm6, %v1313_v45 }
 0x64c   : > { %3895 = vmatprep.mubr.msk.bf16.mxu0 %vm4431_vm5, %v4429_v2  ;;  %3888 = vmatpush3.bf16.msra.mxu0 %v4175_v53  ;;  %v4184_v53 = vld [vmem:[%s5314_s13 + $0x8] sm:$0xff]  }
 0x64d   : > { %v1314_v48 = vpack.c.bf16 %v1306_v47, %v1306_v47  ;;  %3889 = vmatprep.subr.bf16.mxu0 %v4429_v2 }
 0x64f   : > { %3884 = vmatmul.mubr.msk.bf16.vlgmr.msra.gmra.mrb[36].mxu1 %vm829_vm6, %v1314_v48 }
 0x650   : > { %3907 = vmatprep.mubr.msk.bf16.mxu1 %vm4431_vm5, %v4429_v2  ;;  %3890 = vmatpush3.bf16.msra.mxu0 %v4176_v63 }
 0x651   : > { %3891 = vmatprep.subr.bf16.mxu0 %v4429_v2 }
 0x654   : > { %3892 = vmatpush3.bf16.msra.mxu0 %v4177_v3 }
 0x655   : > { %3893 = vmatprep.subr.bf16.mxu0 %v4429_v2 }
 0x658   : > { %3894 = vmatpush3.bf16.msra.mxu0 %v4178_v10 }
 0x659   : > { %3911 = vmatprep.subr.bf16.mxu0 %v4429_v2 }
 0x6b8   : > { %v1363_v49 = vpop.f32.mrb[16].mxu0 }
 0x6b9   : > { %v3843_v50 = vpop.f32.mrb[17].mxu0 }
 0x6ba   : > { %v1366_v51 = vpop.f32.mrb[18].mxu0  ;;  %v4180_v50 = vld [vmem:[#allocation5 + $0x8] sm:$0xff]  }
 0x6bb   : > { %v3844_v52 = vpop.f32.mrb[19].mxu0  ;;  %v4182_v51 = vld [vmem:[#allocation5 + $0x18] sm:$0xff]  }
 0x6bc   : > { %v4183_v52 = vld [vmem:[%s5314_s13] sm:$0xff]  }
 0x709   : > { %v1455_v54 = vpop.f32.mrb[20].mxu0 }
 0x70a   : > { %v1409_v55 = vpop.f32.mrb[24].mxu1  ;;  %1696 = vrot.lane.b32.xlu0 %v1455_v54, %s5335_s29  ;;  %v3855_v56 = vpop.f32.mrb[21].mxu0  ;;  %v4185_v54 = vld [vmem:[%s5314_s13 + $0x10] sm:$0xff]   ;;  %s5369_s29 = smov 48  }
 0x70b   : > { %1692 = vrot.lane.b32.xlu1 %v1409_v55, %s5336_s16  ;;  %v3849_v57 = vpop.f32.mrb[25].mxu1  ;;  %v1458_v58 = vpop.f32.mrb[22].mxu0  ;;  %v4186_v55 = vld [vmem:[%s5314_s13 + $0x18] sm:$0xff]   ;;  %v4187_v56 = vld [vmem:[%s5314_s13 + $0x20] sm:$0xff]   ;;  %s3686_s16 = sshll.u32 %s4543_s22, 6 }
 0x70c   : > { %v1412_v59 = vpop.f32.mrb[26].mxu1  ;;  %v3856_v60 = vpop.f32.mrb[23].mxu0  ;;  %v4188_v57 = vld [vmem:[%s5314_s13 + $0x28] sm:$0xff]  }
 0x70d   : > { %v3850_v61 = vpop.f32.mrb[27].mxu1 }
 0x711   : > { %v1547_v1 = vpop.f32.mrb[24].mxu0 }
 0x712   : > { %v1501_v4 = vpop.f32.mrb[28].mxu1  ;;  %1704 = vrot.lane.b32.xlu0 %v1547_v1, %s5333_s25  ;;  %v3867_v5 = vpop.f32.mrb[25].mxu0  ;;  %s5362_s25 = smov 80  }
 0x713   : > { %1700 = vrot.lane.b32.xlu1 %v1501_v4, %s5334_s17  ;;  %v3861_v6 = vpop.f32.mrb[29].mxu1  ;;  %v1550_v7 = vpop.f32.mrb[26].mxu0  ;;  %s5371_s17 = sld [smem:[#allocation12_spill]] }
 0x714   : > { %v1504_v62 = vpop.f32.mrb[30].mxu1  ;;  %v3868_v8 = vpop.f32.mrb[27].mxu0  ;;  %v3587_v6 = vld [vmem:[%s5310_s9] ss:$0 sm:$0xff] }
 0x715   : > { %v3862_v9 = vpop.f32.mrb[31].mxu1  ;;  %v3588_v62 = vld [vmem:[%s5311_s10] ss:$0 sm:$0xff] }
 0x71a   : > { %v1593_v11 = vpop.f32.mrb[32].mxu1 }
 0x71b   : > { %1708 = vrot.lane.b32.xlu1 %v1593_v11, %s5332_s15  ;;  %v3873_v12 = vpop.f32.mrb[33].mxu1  ;;  %v4189_v11 = vld [vmem:[%s5314_s13 + $0x30] sm:$0xff]   ;;  %s5363_s15 = smov 64  }
 0x71c   : > { %v1596_v13 = vpop.f32.mrb[34].mxu1  ;;  %v4190_v12 = vld [vmem:[%s5314_s13 + $0x38] sm:$0xff]  }
 0x71d   : > { %v3874_v14 = vpop.f32.mrb[35].mxu1  ;;  %v3589_v13 = vld [vmem:[%s5313_s12] ss:$0 sm:$0xff] }
 0x71e   : > { %v1639_v15 = vpop.f32.mrb[28].mxu0 }
 0x71f   : > { %1712 = vrot.lane.b32.xlu0 %v1639_v15, %s5331_s19  ;;  %v3879_v16 = vpop.f32.mrb[29].mxu0  ;;  %s5361_s19 = smov 96  }
 0x720   : > { %v1642_v17 = vpop.f32.mrb[30].mxu0 }
 0x721   : > { %v3880_v18 = vpop.f32.mrb[31].mxu0 }
 0x722   : > { %v1685_v19 = vpop.f32.mrb[36].mxu1 }
 0x723   : > { %1716 = vrot.lane.b32.xlu1 %v1685_v19, %s5330_s28  ;;  %v3885_v20 = vpop.f32.mrb[37].mxu1 }
 0x724   : > { %v1688_v21 = vpop.f32.mrb[38].mxu1  ;;  %v3595_v20 = vld [vmem:[%s5315_s14] ss:$0 sm:$0xff] }
 0x725   : > { %v3886_v22 = vpop.f32.mrb[39].mxu1 }
 0x77c   : > { %v1697_v24 = vpop.permute.xlu0 %1696 }
 0x77d   : > { %v1693_v23 = vpop.permute.xlu1 %1692 }
 0x77e   : > { %v1719_v25 = vsel %vm829_vm6, %v1363_v49, %v1693_v23  ;;  %v4179_v49 = vld [vmem:[#allocation5] sm:$0xff]  }
 0x77f   : > { %v1721_v28 = vsel %vm1720_vm7, %v1719_v25, %v1697_v24  ;;  %3900 = vmatpush3.bf16.msra.mxu1 %v4179_v49 }
 0x780   : > { %3901 = vmatprep.subr.bf16.mxu1 %v4429_v2 }
 0x783   : > { %3902 = vmatpush3.bf16.msra.mxu1 %v4180_v50  ;;  %v3607_v50 = vld [vmem:[%s5306_s5 + $0x1] ss:$0 sm:$0xff] }
 0x784   : > { %v1705_v27 = vpop.permute.xlu0 %1704  ;;  %3903 = vmatprep.subr.bf16.mxu1 %v4429_v2 }
 0x785   : > { %v1701_v26 = vpop.permute.xlu1 %1700 }
 0x786   : > { %v1723_v29 = vsel %vm1722_vm8, %v1721_v28, %v1701_v26 }
 0x787   : > { %v1725_v32 = vsel %vm1724_vm9, %v1723_v29, %v1705_v27 }
 0x78d   : > { %v1709_v30 = vpop.permute.xlu1 %1708 }
 0x78e   : > { %v1727_v33 = vsel %vm1726_vm10, %v1725_v32, %v1709_v30  ;;  %v4193_v30 = vld [vmem:[%s5307_s6 + $0x44] ss:$8 sps:$4 sm:$0xff]   ;;  %v4196_v32 = vld [vmem:[%s5307_s6 + $0x54] ss:$8 sps:$4 sm:$0xff]  }
 0x791   : > { %v1713_v31 = vpop.permute.xlu0 %1712 }
 0x792   : > { %v1729_v35 = vsel %vm1728_vm11, %v1727_v33, %v1713_v31  ;;  %v4191_v31 = vld [vmem:[%s5307_s6 + $0x40] ss:$8 sps:$4 sm:$0xff]   ;;  %v4194_v33 = vld [vmem:[%s5307_s6 + $0x50] ss:$8 sps:$4 sm:$0xff]  }
 0x795   : > { %v1717_v36 = vpop.permute.xlu1 %1716 }
 0x796   : > { %v1731_v37 = vsel %vm1730_vm12, %v1729_v35, %v1717_v36  ;;  %v4199_v35 = vld [vmem:[%s5307_s6 + $0x64] ss:$8 sps:$4 sm:$0xff]   ;;  %v4197_v36 = vld [vmem:[%s5307_s6 + $0x60] ss:$8 sps:$4 sm:$0xff]  }
 0x797   : > { %v1732_v38 = vpack.c.bf16 %v1731_v37, %v1731_v37  ;;  %v4202_v37 = vld [vmem:[%s5307_s6 + $0x74] ss:$8 sps:$4 sm:$0xff]  }
 0x799   : > { %3896 = vmatmul.mubr.msk.bf16.vlgmr.msra.gmra.mrb[32].mxu0 %vm580_vm0, %v1732_v38  ;;  %v4200_v38 = vld [vmem:[%s5307_s6 + $0x70] ss:$8 sps:$4 sm:$0xff]  }
 0x79a   : > { %3927 = vmatprep.mubr.msk.bf16.mxu0 %vm4431_vm5, %v4429_v2  ;;  %3912 = vmatpush3.bf16.msra.mxu0 %v4183_v52 }
 0x79b   : > { %3913 = vmatprep.subr.bf16.mxu0 %v4429_v2 }
 0x79e   : > { %3914 = vmatpush3.bf16.msra.mxu0 %v4184_v53 }
 0x79f   : > { %3915 = vmatprep.subr.bf16.mxu0 %v4429_v2 }
 0x7a2   : > { %3916 = vmatpush3.bf16.msra.mxu0 %v4185_v54 }
 0x7a3   : > { %3917 = vmatprep.subr.bf16.mxu0 %v4429_v2 }
 0x7a6   : > { %3918 = vmatpush3.bf16.msra.mxu0 %v4186_v55 }
 0x7a7   : > { %3919 = vmatprep.subr.bf16.mxu0 %v4429_v2 }
 0x7aa   : > { %3920 = vmatpush3.bf16.msra.mxu0 %v4187_v56 }
 0x7ab   : > { %3921 = vmatprep.subr.bf16.mxu0 %v4429_v2 }
 0x7ae   : > { %3922 = vmatpush3.bf16.msra.mxu0 %v4188_v57 }
 0x7af   : > { %3923 = vmatprep.subr.bf16.mxu0 %v4429_v2 }
 0x7b2   : > { %3924 = vmatpush3.bf16.msra.mxu0 %v4189_v11 }
 0x7b3   : > { %3925 = vmatprep.subr.bf16.mxu0 %v4429_v2 }
 0x7b6   : > { %3926 = vmatpush3.bf16.msra.mxu0 %v4190_v12 }
 0x7b7   : > { %3943 = vmatprep.subr.bf16.mxu0 %v4429_v2 }
 0x86c   : > { %v1809_v40 = vpop.f32.mrb[32].mxu0 }
 0x86d   : > { %v1810_v41 = vadd.f32 %v3581_v39, %v1809_v40  ;;  %v3897_v42 = vpop.f32.mrb[33].mxu0 }
 0x86e   : > { %v1812_v43 = vpop.f32.mrb[34].mxu0 }
 0x86f   : > { %v4914_v44 = vadd.f32 %v1810_v41, %v4683_v34  ;;  %v3898_v45 = vpop.f32.mrb[35].mxu0  ;;  %v4181_v34 = vld [vmem:[#allocation5 + $0x10] sm:$0xff]  }
 0x870   : > { %3904 = vmatpush3.bf16.msra.mxu1 %v4181_v34 }
 0x871   : > { %v1818_v46 = vsel %vm580_vm0, %v4914_v44, 0.0  ;;  %v1822_v47 = vmul.f32 %v4914_v44, %v4914_v44  ;;  %3905 = vmatprep.subr.bf16.mxu1 %v4429_v2 }
 0x872   : > { %1819 = vadd.xlane.f32.xlu0 %v1818_v46 }
 0x873   : > { %v1823_v48 = vsel %vm580_vm0, %v1822_v47, 0.0 }
 0x874   : > { %1824 = vadd.xlane.f32.xlu1 %v1823_v48  ;;  %3906 = vmatpush3.bf16.msra.mxu1 %v4182_v51  ;;  %v3606_v48 = vld [vmem:[%s5305_s4 + $0x1] ss:$0 sm:$0xff] }
 0x875   : > { %2130 = vmatprep.subr.bf16.mxu1 %v4193_v30 }
 0x8ff   : > { %v1820_v58 = vpop.xlane.xlu0 %1819 }
 0x900   : > { %v1821_v59 = vmul.f32 0.015625, %v1820_v58 }
 0x901   : > { %v1825_v60 = vpop.xlane.xlu1 %1824 }
 0x902   : > { %v1827_v61 = vmul.f32 %v1821_v59, %v1821_v59  ;;  %v1826_v63 = vmul.f32 0.015625, %v1825_v60  ;;  %v1829_v4 = vsub.f32 %v4914_v44, %v1821_v59 }
 0x904   : > { %v1828_v1 = vsub.f32 %v1826_v63, %v1827_v61 }
 0x906   : > { %v1830_v3 = vadd.f32 1e-05, %v1828_v1 }
 0x908   : > { %4253 = vrsqrt.f32 %v1830_v3 }
 0x912   : > { %v4254_v5 = vpop.eup %4253 }
 0x913   : > { %v1832_v7 = vmul.f32 %v4254_v5, %v1829_v4 }
 0x915   : > { %v1839_v8 = vmul.f32 %v3587_v6, %v1832_v7 }
 0x917   : > { %v1846_v9 = vadd.f32 %v3588_v62, %v1839_v8 }
 0x919   : > { %v1847_v10 = vpack.c.bf16 %v1846_v9, %v1846_v9 }
 0x91b   : > { %3908 = vmatmul.mubr.msk.bf16.vlgmr.msra.gmra.mrb[40].mxu1 %vm580_vm0, %v1847_v10 }
 0x91c   : > { %2162 = vmatprep.mubr.bf16.mxu1 %v4423_v0  ;;  %2131 = vmatpush1.bf16.msra.mxu1 %v4191_v31 }
 0x91d   : > { %2132 = vmatprep.subr.bf16.mxu1 %v4196_v32 }
 0x920   : > { %2133 = vmatpush1.bf16.msra.mxu1 %v4194_v33 }
 0x921   : > { %2134 = vmatprep.subr.bf16.mxu1 %v4199_v35 }
 0x924   : > { %2135 = vmatpush1.bf16.msra.mxu1 %v4197_v36 }
 0x925   : > { %2136 = vmatprep.subr.bf16.mxu1 %v4202_v37 }
 0x928   : > { %2137 = vmatpush1.bf16.msra.mxu1 %v4200_v38 }
 0x929   : > { %3931 = vmatprep.subr.bf16.mxu1 %v4429_v2 }
 0x9ee   : > { %v1924_v14 = vpop.f32.mrb[40].mxu1 }
 0x9ef   : > { %v1925_v0 = vadd.f32 %v3589_v13, %v1924_v14  ;;  %v3909_v15 = vpop.f32.mrb[41].mxu1 }
 0x9f0   : > { %v1927_v16 = vpop.f32.mrb[42].mxu1 }
 0x9f1   : > { %v1930_v17 = vmax.f32 %v1925_v0, 0.0  ;;  %v3910_v18 = vpop.f32.mrb[43].mxu1 }
 0x9f3   : > { %v1931_v19 = vpack.c.bf16 %v1930_v17, %v1930_v17 }
 0x9f5   : > { %3928 = vmatmul.mubr.bf16.vlgmr.msra.gmra.mrb[36].mxu0 %v1931_v19 }
 0x9f6   : > { %3945 = vmatprep.mubr.msk.bf16.mxu0 %vm4431_vm5, %v4429_v2 }
 0xac8   : > { %v2037_v21 = vpop.f32.mrb[36].mxu0 }
 0xac9   : > { %v2038_v22 = vadd.f32 %v3595_v20, %v2037_v21  ;;  %v3929_v23 = vpop.f32.mrb[37].mxu0 }
 0xaca   : > { %v2040_v24 = vpop.f32.mrb[38].mxu0 }
 0xacb   : > { %v4974_v25 = vadd.f32 %v2038_v22, %v4914_v44  ;;  %v3930_v26 = vpop.f32.mrb[39].mxu0 }
 0xacd   : > { %v2048_v27 = vsel %vm580_vm0, %v4974_v25, 0.0  ;;  %v2052_v28 = vmul.f32 %v4974_v25, %v4974_v25 }
 0xace   : > { %2049 = vadd.xlane.f32.xlu0 %v2048_v27 }
 0xacf   : > { %v2053_v29 = vsel %vm580_vm0, %v2052_v28, 0.0 }
 0xad2   : > { %2054 = vadd.xlane.f32.xlu0 %v2053_v29 }
 0xb5b   : > { %v2050_v39 = vpop.xlane.xlu0 %2049 }
 0xb5c   : > { %v2051_v40 = vmul.f32 0.015625, %v2050_v39 }
 0xb5e   : > { %v2057_v42 = vmul.f32 %v2051_v40, %v2051_v40  ;;  %v2059_v46 = vsub.f32 %v4974_v25, %v2051_v40 }
 0xb5f   : > { %v2055_v41 = vpop.xlane.xlu0 %2054 }
 0xb60   : > { %v2056_v43 = vmul.f32 0.015625, %v2055_v41 }
 0xb62   : > { %v2058_v44 = vsub.f32 %v2056_v43, %v2057_v42 }
 0xb64   : > { %v2060_v45 = vadd.f32 1e-05, %v2058_v44 }
 0xb66   : > { %4255 = vrsqrt.f32 %v2060_v45 }
 0xb70   : > { %v4256_v47 = vpop.eup %4255 }
 0xb71   : > { %v2062_v49 = vmul.f32 %v4256_v47, %v2059_v46 }
 0xb73   : > { %v2069_v34 = vmul.f32 %v3606_v48, %v2062_v49 }
 0xb75   : > { %v2076_v51 = vadd.f32 %v3607_v50, %v2069_v34 }
 0xb77   : > { %v2077_v52 = vpack.c.bf16 %v2076_v51, %v2076_v51 }
 0xb79   : > { %3624 = vmatmul.mubr.msk.bf16.vlgmr.msra.gmra.mrb[44].mxu1 %vm580_vm0, %v2077_v52 }
 0xb7a   : > { %3933 = vmatprep.mubr.msk.bf16.mxu1 %vm4431_vm5, %v4429_v2 }
 0xc4c   : > { %v2164_v53 = vpop.f32.mrb[44].mxu1 }
 0xc4d   : > { %2175 = vrot.lane.b32.xlu0 %v2164_v53, %s4425_s30  ;;  %2172 = vrot.lane.b32.xlu1 %v2164_v53, %s4426_s23  ;;  %v5018_v54 = vpop.f32.mrb[45].mxu1  ;;  %v2215_v57 = vpack.c.bf16 %v2164_v53, %v2164_v53 }
 0xc4e   : > { %v2168_v55 = vpop.f32.mrb[46].mxu1  ;;  %v2711_v24 = vpack.c.bf16 %v5018_v54, %v5018_v54 }
 0xc4f   : > { %v2169_v56 = vpop.f32.mrb[47].mxu1 }
 0xc50   : > { %v2723_v27 = vsel %vm647_vm4, %v2711_v24, 0 }
 0xc51   : > { %2184 = vrot.lane.b32.xlu0 %v2164_v53, %s4432_s18  ;;  %2178 = vrot.lane.b32.xlu1 %v2164_v53, %s4428_s20 }
 0xc55   : > { %2190 = vrot.lane.b32.xlu0 %v2164_v53, %s4427_s26  ;;  %2181 = vrot.lane.b32.xlu1 %v2164_v53, %s5361_s19 }
 0xc59   : > { %2187 = vrot.lane.b32.xlu1 %v2164_v53, %s5362_s25 }
 0xc5d   : > { %2224 = vrot.lane.b32.xlu1 %v2215_v57, %s5363_s15 }
 0xcbf   : > { %v2176_v58 = vpop.permute.xlu0 %2175  ;;  %v2173_v59 = vpop.permute.xlu1 %2172 }
 0xcc0   : > { %v2217_v60 = vpack.c.bf16 %v2176_v58, %v2176_v58  ;;  %v2216_v61 = vpack.c.bf16 %v2173_v59, %v2173_v59 }
 0xcc2   : > { %2273 = vrot.lane.b32.xlu0 %v2216_v61, %s5363_s15  ;;  %2322 = vrot.lane.b32.xlu1 %v2217_v60, %s5363_s15 }
 0xcc3   : > { %v2185_v63 = vpop.permute.xlu0 %2184  ;;  %v2179_v1 = vpop.permute.xlu1 %2178 }
 0xcc4   : > { %v2218_v3 = vpack.c.bf16 %v2179_v1, %v2179_v1  ;;  %v2220_v5 = vpack.c.bf16 %v2185_v63, %v2185_v63 }
 0xcc6   : > { %2371 = vrot.lane.b32.xlu0 %v2218_v3, %s5363_s15 }
 0xcc7   : > { %v2182_v4 = vpop.permute.xlu1 %2181  ;;  %v2191_v7 = vpop.permute.xlu0 %2190 }
 0xcc8   : > { %v2219_v6 = vpack.c.bf16 %v2182_v4, %v2182_v4  ;;  %v2222_v8 = vpack.c.bf16 %v2191_v7, %v2191_v7 }
 0xcca   : > { %2469 = vrot.lane.b32.xlu0 %v2220_v5, %s5363_s15  ;;  %2420 = vrot.lane.b32.xlu1 %v2219_v6, %s5363_s15 }
 0xccb   : > { %v2188_v62 = vpop.permute.xlu1 %2187 }
 0xccc   : > { %v2221_v9 = vpack.c.bf16 %v2188_v62, %v2188_v62 }
 0xcce   : > { %2567 = vrot.lane.b32.xlu0 %v2222_v8, %s5363_s15  ;;  %2518 = vrot.lane.b32.xlu1 %v2221_v9, %s5363_s15 }
 0xccf   : > { %v2225_v10 = vpop.permute.xlu1 %2224 }
 0xcd0   : > { %v2230_v11 = vsel %vm829_vm6, %v2225_v10, 0 }
 0xcd1   : > { %3932 = vmatpush3.bf16.xpose.msra.mxu1 %v2230_v11 }
 0xcd2   : > { %2194 = vrot.lane.b32.xlu0 %v5018_v54, %s4426_s23  ;;  %3937 = vmatprep.subr.bf16.mxu1 %v4429_v2  ;;  %s5365_s23 = smov 16  }
 0xcd8   : > { %3934 = vmatmul.mubr.msk.bf16.vlgmr.msra.gmra.mrb[48].mxu1 %vm829_vm6, %v2215_v57 }
 0xcd9   : > { %3939 = vmatprep.mubr.msk.bf16.mxu1 %vm4431_vm5, %v4429_v2 }
 0xd34   : > { %v2274_v12 = vpop.permute.xlu0 %2273  ;;  %v2323_v13 = vpop.permute.xlu1 %2322 }
 0xd35   : > { %v2279_v14 = vsel %vm829_vm6, %v2274_v12, 0  ;;  %v2328_v0 = vsel %vm829_vm6, %v2323_v13, 0 }
 0xd36   : > { %3938 = vmatpush3.bf16.xpose.msra.mxu1 %v2279_v14  ;;  %3944 = vmatpush3.bf16.xpose.msra.mxu0 %v2328_v0 }
 0xd37   : > { %3949 = vmatprep.subr.bf16.mxu1 %v4429_v2  ;;  %3955 = vmatprep.subr.bf16.mxu0 %v4429_v2 }
 0xd38   : > { %v2372_v15 = vpop.permute.xlu0 %2371 }
 0xd39   : > { %v2377_v17 = vsel %vm829_vm6, %v2372_v15, 0 }
 0xd3c   : > { %v2421_v16 = vpop.permute.xlu1 %2420  ;;  %v2470_v19 = vpop.permute.xlu0 %2469 }
 0xd3d   : > { %v2426_v18 = vsel %vm829_vm6, %v2421_v16, 0  ;;  %3940 = vmatmul.mubr.msk.bf16.vlgmr.msra.gmra.mrb[52].mxu1 %vm829_vm6, %v2216_v61  ;;  %3946 = vmatmul.mubr.msk.bf16.vlgmr.msra.gmra.mrb[40].mxu0 %vm829_vm6, %v2217_v60  ;;  %v2475_v21 = vsel %vm829_vm6, %v2470_v19, 0 }
 0xd3e   : > { %3950 = vmatpush3.bf16.xpose.msra.mxu1 %v2377_v17  ;;  %3956 = vmatpush3.bf16.xpose.msra.mxu0 %v2426_v18 }
 0xd3f   : > { %3951 = vmatprep.mubr.msk.bf16.mxu1 %vm4431_vm5, %v4429_v2  ;;  %3957 = vmatprep.mubr.msk.bf16.mxu0 %vm4431_vm5, %v4429_v2 }
 0xd40   : > { %3961 = vmatprep.subr.bf16.mxu1 %v4429_v2  ;;  %3967 = vmatprep.subr.bf16.mxu0 %v4429_v2  ;;  %v2519_v20 = vpop.permute.xlu1 %2518  ;;  %v2568_v23 = vpop.permute.xlu0 %2567 }
 0xd41   : > { %v2524_v22 = vsel %vm829_vm6, %v2519_v20, 0  ;;  %v2573_v26 = vsel %vm829_vm6, %v2568_v23, 0 }
 0xd44   : > { %v2195_v28 = vpop.permute.xlu0 %2194 }
 0xd45   : > { %3952 = vmatmul.mubr.msk.bf16.vlgmr.msra.gmra.mrb[56].mxu1 %vm829_vm6, %v2218_v3  ;;  %3958 = vmatmul.mubr.msk.bf16.vlgmr.msra.gmra.mrb[44].mxu0 %vm829_vm6, %v2219_v6  ;;  %v2712_v29 = vpack.c.bf16 %v2195_v28, %v2195_v28 }
 0xd46   : > { %3962 = vmatpush3.bf16.xpose.msra.mxu1 %v2475_v21  ;;  %3968 = vmatpush3.bf16.xpose.msra.mxu0 %v2524_v22 }
 0xd47   : > { %3963 = vmatprep.mubr.msk.bf16.mxu1 %vm4431_vm5, %v4429_v2  ;;  %3969 = vmatprep.mubr.msk.bf16.mxu0 %vm4431_vm5, %v4429_v2  ;;  %v2769_v30 = vsel %vm647_vm4, %v2712_v29, 0 }
 0xd48   : > { %3973 = vmatprep.subr.bf16.mxu1 %v4429_v2  ;;  %3979 = vmatprep.subr.bf16.mxu0 %v4429_v2 }
 0xd4d   : > { %3964 = vmatmul.mubr.msk.bf16.vlgmr.msra.gmra.mrb[60].mxu1 %vm829_vm6, %v2220_v5  ;;  %3970 = vmatmul.mubr.msk.bf16.vlgmr.msra.gmra.mrb[48].mxu0 %vm829_vm6, %v2221_v9 }
 0xd4e   : > { %3974 = vmatpush3.bf16.xpose.msra.mxu1 %v2573_v26  ;;  %3980 = vmatpush3.bf16.msra.mxu0 %v2723_v27 }
 0xd4f   : > { %3975 = vmatprep.mubr.msk.bf16.mxu1 %vm4431_vm5, %v4429_v2  ;;  %3985 = vmatprep.subr.bf16.mxu1 %v4429_v2 }
 0xd50   : > { %3981 = vmatprep.mubr.msk.bf16.mxu0 %vm4431_vm5, %v4429_v2  ;;  %3991 = vmatprep.subr.bf16.mxu0 %v4429_v2 }
 0xd55   : > { %3976 = vmatmul.mubr.msk.bf16.vlgmr.msra.gmra.mrb[64].mxu1 %vm829_vm6, %v2222_v8 }
 0xd56   : > { %3986 = vmatpush3.bf16.msra.mxu1 %v2769_v30  ;;  %3987 = vmatprep.mubr.msk.bf16.mxu1 %vm4431_vm5, %v4429_v2 }
 0xd57   : > { %3997 = vmatprep.subr.bf16.mxu1 %v4429_v2 }
 0xdab   : > { %v2266_v31 = vpop.f32.mrb[48].mxu1 }
 0xdac   : > { %v3935_v32 = vpop.f32.mrb[49].mxu1  ;;  %v2615_v33 = vsel %vm829_vm6, %v2266_v31, -inf }
 0xdad   : > { %2616 = vmax.xlane.f32.xlu1 %v2615_v33  ;;  %v2269_v35 = vpop.f32.mrb[50].mxu1 }
 0xdae   : > { %v3936_v36 = vpop.f32.mrb[51].mxu1 }
 0xe10   : > { %v2315_v37 = vpop.f32.mrb[52].mxu1  ;;  %v2364_v38 = vpop.f32.mrb[40].mxu0 }
 0xe11   : > { %v3941_v39 = vpop.f32.mrb[53].mxu1  ;;  %v3947_v40 = vpop.f32.mrb[41].mxu0  ;;  %v2618_v41 = vsel %vm829_vm6, %v2315_v37, -inf  ;;  %v2621_v46 = vsel %vm829_vm6, %v2364_v38, -inf }
 0xe12   : > { %v2367_v42 = vpop.f32.mrb[42].mxu0  ;;  %2619 = vmax.xlane.f32.xlu0 %v2618_v41  ;;  %v2318_v43 = vpop.f32.mrb[54].mxu1 }
 0xe13   : > { %v3942_v44 = vpop.f32.mrb[55].mxu1  ;;  %v3948_v45 = vpop.f32.mrb[43].mxu0 }
 0xe16   : > { %2622 = vmax.xlane.f32.xlu0 %v2621_v46 }
 0xe18   : > { %v2413_v47 = vpop.f32.mrb[56].mxu1  ;;  %v2462_v48 = vpop.f32.mrb[44].mxu0 }
 0xe19   : > { %v3953_v49 = vpop.f32.mrb[57].mxu1  ;;  %v3959_v50 = vpop.f32.mrb[45].mxu0  ;;  %v2627_v34 = vsel %vm829_vm6, %v2462_v48, -inf  ;;  %v2624_v51 = vsel %vm829_vm6, %v2413_v47, -inf }
 0xe1a   : > { %v2465_v52 = vpop.f32.mrb[46].mxu0  ;;  %2628 = vmax.xlane.f32.xlu0 %v2627_v34  ;;  %2625 = vmax.xlane.f32.xlu1 %v2624_v51  ;;  %v2416_v53 = vpop.f32.mrb[58].mxu1 }
 0xe1b   : > { %v3954_v55 = vpop.f32.mrb[59].mxu1  ;;  %v3960_v56 = vpop.f32.mrb[47].mxu0 }
 0xe20   : > { %v2511_v57 = vpop.f32.mrb[60].mxu1  ;;  %v2560_v58 = vpop.f32.mrb[48].mxu0 }
 0xe21   : > { %v3965_v59 = vpop.f32.mrb[61].mxu1  ;;  %v3971_v60 = vpop.f32.mrb[49].mxu0  ;;  %v2633_v61 = vsel %vm829_vm6, %v2560_v58, -inf  ;;  %v2630_v63 = vsel %vm829_vm6, %v2511_v57, -inf }
 0xe22   : > { %v2563_v1 = vpop.f32.mrb[50].mxu0  ;;  %2634 = vmax.xlane.f32.xlu0 %v2633_v61  ;;  %2631 = vmax.xlane.f32.xlu1 %v2630_v63  ;;  %v2514_v3 = vpop.f32.mrb[62].mxu1 }
 0xe23   : > { %v3966_v4 = vpop.f32.mrb[63].mxu1  ;;  %v3972_v5 = vpop.f32.mrb[51].mxu0 }
 0xe28   : > { %v2609_v6 = vpop.f32.mrb[64].mxu1 }
 0xe29   : > { %v3977_v7 = vpop.f32.mrb[65].mxu1  ;;  %v2636_v62 = vsel %vm829_vm6, %v2609_v6, -inf }
 0xe2a   : > { %2637 = vmax.xlane.f32.xlu1 %v2636_v62  ;;  %v2612_v8 = vpop.f32.mrb[66].mxu1 }
 0xe2b   : > { %v3978_v9 = vpop.f32.mrb[67].mxu1 }
 0xe38   : > { %2200 = vrot.lane.b32.xlu0 %v5018_v54, %s4428_s20  ;;  %s5367_s20 = smov 32  }
 0xe3a   : > { %v2617_v10 = vpop.xlane.xlu1 %2616 }
 0xe3b   : > { %2197 = vrot.lane.b32.xlu1 %v5018_v54, %s4425_s30  ;;  %v2639_v11 = vsub.f32 %v2266_v31, %v2617_v10  ;;  %s5364_s30 = smov 8  }
 0xe3d   : > { %v2647_v12 = vmul.f32 1.442695, %v2639_v11 }
 0xe3f   : > { %4257 = vpow2.f32 %v2647_v12 }
 0xe49   : > { %v4258_v13 = vpop.eup %4257 }
 0xe4a   : > { %v2663_v14 = vsel %vm829_vm6, %v4258_v13, 0.0 }
 0xe57   : > { %2664 = vadd.xlane.f32.xlu0 %v2663_v14 }
 0xe9f   : > { %v2620_v0 = vpop.xlane.xlu0 %2619 }
 0xea0   : > { %v2640_v15 = vsub.f32 %v2315_v37, %v2620_v0 }
 0xea2   : > { %v2649_v16 = vmul.f32 1.442695, %v2640_v15 }
 0xea3   : > { %v2623_v17 = vpop.xlane.xlu0 %2622 }
 0xea4   : > { %4259 = vpow2.f32 %v2649_v16  ;;  %v2641_v18 = vsub.f32 %v2364_v38, %v2623_v17 }
 0xea6   : > { %v2651_v19 = vmul.f32 1.442695, %v2641_v18 }
 0xea7   : > { %v2626_v24 = vpop.xlane.xlu1 %2625  ;;  %v2629_v26 = vpop.xlane.xlu0 %2628 }
 0xea8   : > { %4261 = vpow2.f32 %v2651_v19  ;;  %v2642_v27 = vsub.f32 %v2413_v47, %v2626_v24  ;;  %v2643_v29 = vsub.f32 %v2462_v48, %v2629_v26 }
 0xeaa   : > { %v2653_v30 = vmul.f32 1.442695, %v2642_v27  ;;  %v2655_v33 = vmul.f32 1.442695, %v2643_v29 }
 0xeac   : > { %4263 = vpow2.f32 %v2653_v30 }
 0xead   : > { %4265 = vpow2.f32 %v2655_v33 }
 0xeae   : > { %v5094_v20 = vpop.eup %4259 }
 0xeaf   : > { %v2666_v21 = vsel %vm829_vm6, %v5094_v20, 0.0  ;;  %v2632_v28 = vpop.xlane.xlu1 %2631  ;;  %v2635_v32 = vpop.xlane.xlu0 %2634 }
 0xeb0   : > { %2667 = vadd.xlane.f32.xlu1 %v2666_v21  ;;  %v2644_v31 = vsub.f32 %v2511_v57, %v2632_v28  ;;  %v2645_v35 = vsub.f32 %v2560_v58, %v2635_v32 }
 0xeb2   : > { %v5098_v22 = vpop.eup %4261  ;;  %v2657_v36 = vmul.f32 1.442695, %v2644_v31  ;;  %v2659_v38 = vmul.f32 1.442695, %v2645_v35 }
 0xeb3   : > { %v2669_v23 = vsel %vm829_vm6, %v5098_v22, 0.0  ;;  %v2201_v41 = vpop.permute.xlu0 %2200 }
 0xeb4   : > { %2670 = vadd.xlane.f32.xlu0 %v2669_v23  ;;  %4267 = vpow2.f32 %v2657_v36  ;;  %v2714_v63 = vpack.c.bf16 %v2201_v41, %v2201_v41 }
 0xeb5   : > { %4269 = vpow2.f32 %v2659_v38 }
 0xeb6   : > { %v5106_v42 = vpop.eup %4263 }
 0xeb7   : > { %v2638_v37 = vpop.xlane.xlu1 %2637  ;;  %v5108_v43 = vpop.eup %4265  ;;  %v2672_v45 = vsel %vm829_vm6, %v5106_v42, 0.0 }
 0xeb8   : > { %v2646_v39 = vsub.f32 %v2609_v6, %v2638_v37  ;;  %v2675_v47 = vsel %vm829_vm6, %v5108_v43, 0.0  ;;  %v2861_v6 = vsel %vm647_vm4, %v2714_v63, 0 }
 0xeba   : > { %v2661_v40 = vmul.f32 1.442695, %v2646_v39 }
 0xebb   : > { %v2198_v51 = vpop.permute.xlu1 %2197 }
 0xebc   : > { %4271 = vpow2.f32 %v2661_v40  ;;  %v2713_v53 = vpack.c.bf16 %v2198_v51, %v2198_v51  ;;  %v4204_v51 = vld [vmem:[#allocation2 + $0x28] sm:$0xff]  }
 0xebe   : > { %v5112_v46 = vpop.eup %4267  ;;  %v2815_v58 = vsel %vm647_vm4, %v2713_v53, 0 }
 0xebf   : > { %v2678_v48 = vsel %vm829_vm6, %v5112_v46, 0.0  ;;  %v5118_v49 = vpop.eup %4269 }
 0xec0   : > { %v2681_v50 = vsel %vm829_vm6, %v5118_v49, 0.0 }
 0xec1   : > { %2206 = vrot.lane.b32.xlu1 %v5018_v54, %s4432_s18  ;;  %s5368_s18 = smov 40  }
 0xec6   : > { %v5122_v34 = vpop.eup %4271 }
 0xec7   : > { %v2684_v56 = vsel %vm829_vm6, %v5122_v34, 0.0 }
 0xeca   : > { %2203 = vrot.lane.b32.xlu0 %v5018_v54, %s5361_s19 }
 0xee4   : > { %v2665_v44 = vpop.xlane.xlu0 %2664 }
 0xee5   : > { %4273 = vrcp.f32 %v2665_v44  ;;  %2673 = vadd.xlane.f32.xlu1 %v2672_v45 }
 0xee9   : > { %2676 = vadd.xlane.f32.xlu0 %v2675_v47  ;;  %2679 = vadd.xlane.f32.xlu1 %v2678_v48 }
 0xeed   : > { %2682 = vadd.xlane.f32.xlu1 %v2681_v50 }
 0xeef   : > { %v4274_v52 = vpop.eup %4273 }
 0xef0   : > { %v2695_v55 = vmul.f32 %v4274_v52, %v4258_v13  ;;  %v4205_v52 = vld [vmem:[#allocation2 + $0x30] sm:$0xff]  }
 0xef1   : > { %2685 = vadd.xlane.f32.xlu1 %v2684_v56 }
 0xef2   : > { %v2703_v57 = vpack.c.bf16 %v2695_v55, %v2695_v55 }
 0xef4   : > { %3982 = vmatmul.mubr.msk.bf16.vlgmr.msra.gmra.mrb[52].mxu0 %vm829_vm6, %v2703_v57 }
 0xef5   : > { %3992 = vmatpush3.bf16.msra.mxu0 %v2815_v58  ;;  %3993 = vmatprep.mubr.msk.bf16.mxu0 %vm4431_vm5, %v4429_v2  ;;  %v4206_v58 = vld [vmem:[#allocation2 + $0x38] sm:$0xff]  }
 0xef6   : > { %4003 = vmatprep.subr.bf16.mxu0 %v4429_v2 }
 0xeff   : > { %2209 = vrot.lane.b32.xlu0 %v5018_v54, %s5362_s25 }
 0xf02   : > { %2212 = vrot.lane.b32.xlu1 %v5018_v54, %s4427_s26  ;;  %s5366_s26 = smov 24  }
 0xf3d   : > { %v2668_v59 = vpop.xlane.xlu1 %2667 }
 0xf3e   : > { %4275 = vrcp.f32 %v2668_v59 }
 0xf41   : > { %v2671_v60 = vpop.xlane.xlu0 %2670  ;;  %v2207_v9 = vpop.permute.xlu1 %2206 }
 0xf42   : > { %4277 = vrcp.f32 %v2671_v60  ;;  %v2716_v0 = vpack.c.bf16 %v2207_v9, %v2207_v9 }
 0xf44   : > { %v2953_v21 = vsel %vm647_vm4, %v2716_v0, 0 }
 0xf45   : > { %v2204_v3 = vpop.permute.xlu0 %2203 }
 0xf46   : > { %v2715_v62 = vpack.c.bf16 %v2204_v3, %v2204_v3 }
 0xf48   : > { %v4276_v61 = vpop.eup %4275  ;;  %v2907_v8 = vsel %vm647_vm4, %v2715_v62, 0 }
 0xf49   : > { %v2696_v1 = vmul.f32 %v4276_v61, %v5094_v20 }
 0xf4b   : > { %v2704_v4 = vpack.c.bf16 %v2696_v1, %v2696_v1 }
 0xf4c   : > { %v4278_v5 = vpop.eup %4277 }
 0xf4d   : > { %v2697_v7 = vmul.f32 %v4278_v5, %v5098_v22  ;;  %3988 = vmatmul.mubr.msk.bf16.vlgmr.msra.gmra.mrb[68].mxu1 %vm829_vm6, %v2704_v4 }
 0xf4e   : > { %3998 = vmatpush3.bf16.msra.mxu1 %v2861_v6  ;;  %3999 = vmatprep.mubr.msk.bf16.mxu1 %vm4431_vm5, %v4429_v2 }
 0xf4f   : > { %v2705_v54 = vpack.c.bf16 %v2697_v7, %v2697_v7  ;;  %4009 = vmatprep.subr.bf16.mxu1 %v4429_v2 }
 0xf51   : > { %3994 = vmatmul.mubr.msk.bf16.vlgmr.msra.gmra.mrb[56].mxu0 %vm829_vm6, %v2705_v54 }
 0xf52   : > { %4004 = vmatpush3.bf16.msra.mxu0 %v2907_v8  ;;  %4005 = vmatprep.mubr.msk.bf16.mxu0 %vm4431_vm5, %v4429_v2 }
 0xf53   : > { %4015 = vmatprep.subr.bf16.mxu0 %v4429_v2 }
 0xf72   : > { %v2674_v10 = vpop.xlane.xlu1 %2673 }
 0xf73   : > { %4279 = vrcp.f32 %v2674_v10 }
 0xf76   : > { %v2677_v11 = vpop.xlane.xlu0 %2676  ;;  %v2680_v12 = vpop.xlane.xlu1 %2679 }
 0xf77   : > { %4281 = vrcp.f32 %v2677_v11 }
 0xf78   : > { %4283 = vrcp.f32 %v2680_v12 }
 0xf7a   : > { %v2683_v13 = vpop.xlane.xlu1 %2682  ;;  %v2210_v17 = vpop.permute.xlu0 %2209 }
 0xf7b   : > { %4285 = vrcp.f32 %v2683_v13  ;;  %v2717_v23 = vpack.c.bf16 %v2210_v17, %v2210_v17 }
 0xf7d   : > { %v4280_v14 = vpop.eup %4279  ;;  %v2999_v29 = vsel %vm647_vm4, %v2717_v23, 0 }
 0xf7e   : > { %v2698_v15 = vmul.f32 %v4280_v14, %v5106_v42  ;;  %v2686_v16 = vpop.xlane.xlu1 %2685 }
 0xf7f   : > { %4287 = vrcp.f32 %v2686_v16 }
 0xf80   : > { %v2706_v18 = vpack.c.bf16 %v2698_v15, %v2698_v15 }
 0xf81   : > { %v4282_v19 = vpop.eup %4281 }
 0xf82   : > { %v4284_v20 = vpop.eup %4283  ;;  %v2699_v22 = vmul.f32 %v4282_v19, %v5108_v43  ;;  %4000 = vmatmul.mubr.msk.bf16.vlgmr.msra.gmra.mrb[72].mxu1 %vm829_vm6, %v2706_v18  ;;  %v2213_v24 = vpop.permute.xlu1 %2212 }
 0xf83   : > { %4010 = vmatpush3.bf16.msra.mxu1 %v2953_v21  ;;  %4011 = vmatprep.mubr.msk.bf16.mxu1 %vm4431_vm5, %v4429_v2  ;;  %v2700_v26 = vmul.f32 %v4284_v20, %v5112_v46  ;;  %v2718_v30 = vpack.c.bf16 %v2213_v24, %v2213_v24 }
 0xf84   : > { %v2707_v27 = vpack.c.bf16 %v2699_v22, %v2699_v22  ;;  %4021 = vmatprep.subr.bf16.mxu1 %v4429_v2 }
 0xf85   : > { %v4286_v28 = vpop.eup %4285  ;;  %v2708_v32 = vpack.c.bf16 %v2700_v26, %v2700_v26  ;;  %v3045_v35 = vsel %vm647_vm4, %v2718_v30, 0 }
 0xf86   : > { %4006 = vmatmul.mubr.msk.bf16.vlgmr.msra.gmra.mrb[60].mxu0 %vm829_vm6, %v2707_v27  ;;  %v2701_v31 = vmul.f32 %v4286_v28, %v5118_v49  ;;  %v3642_v27 = vld [vmem:[%s5309_s8 + $0x1] ss:$0 sm:$0xff] }
 0xf87   : > { %4016 = vmatpush3.bf16.msra.mxu0 %v2999_v29  ;;  %4017 = vmatprep.mubr.msk.bf16.mxu0 %vm4431_vm5, %v4429_v2 }
 0xf88   : > { %4027 = vmatprep.subr.bf16.mxu0 %v4429_v2  ;;  %v2709_v37 = vpack.c.bf16 %v2701_v31, %v2701_v31 }
 0xf89   : > { %v4288_v33 = vpop.eup %4287 }
 0xf8a   : > { %4012 = vmatmul.mubr.msk.bf16.vlgmr.msra.gmra.mrb[76].mxu1 %vm829_vm6, %v2708_v32  ;;  %v2702_v36 = vmul.f32 %v4288_v33, %v5122_v34  ;;  %v4203_v34 = vld [vmem:[#allocation2 + $0x20] sm:$0xff]  }
 0xf8b   : > { %4022 = vmatpush3.bf16.msra.mxu1 %v3045_v35  ;;  %4023 = vmatprep.mubr.msk.bf16.mxu1 %vm4431_vm5, %v4429_v2 }
 0xf8c   : > { %4039 = vmatprep.subr.bf16.mxu1 %v4429_v2  ;;  %v2710_v38 = vpack.c.bf16 %v2702_v36, %v2702_v36 }
 0xf8e   : > { %4018 = vmatmul.mubr.msk.bf16.vlgmr.msra.gmra.mrb[64].mxu0 %vm829_vm6, %v2709_v37 }
 0xf8f   : > { %4035 = vmatprep.mubr.msk.bf16.mxu0 %vm4431_vm5, %v4429_v2  ;;  %4028 = vmatpush3.bf16.msra.mxu0 %v4203_v34 }
 0xf90   : > { %4029 = vmatprep.subr.bf16.mxu0 %v4429_v2 }
 0xf92   : > { %4024 = vmatmul.mubr.msk.bf16.vlgmr.msra.gmra.mrb[80].mxu1 %vm829_vm6, %v2710_v38  ;;  %v4207_v38 = vld [vmem:[#allocation5 + $0x20] sm:$0xff]  }
 0xf93   : > { %4047 = vmatprep.mubr.msk.bf16.mxu1 %vm4431_vm5, %v4429_v2  ;;  %4030 = vmatpush3.bf16.msra.mxu0 %v4204_v51 }
 0xf94   : > { %4031 = vmatprep.subr.bf16.mxu0 %v4429_v2  ;;  %4040 = vmatpush3.bf16.msra.mxu1 %v4207_v38 }
 0xf95   : > { %4041 = vmatprep.subr.bf16.mxu1 %v4429_v2 }
 0xf97   : > { %4032 = vmatpush3.bf16.msra.mxu0 %v4205_v52 }
 0xf98   : > { %4033 = vmatprep.subr.bf16.mxu0 %v4429_v2 }
 0xf9b   : > { %4034 = vmatpush3.bf16.msra.mxu0 %v4206_v58  ;;  %v3651_v58 = vld [vmem:[%s5311_s10 + $0x1] ss:$0 sm:$0xff] }
 0xf9c   : > { %4051 = vmatprep.subr.bf16.mxu0 %v4429_v2 }
 0xfc7   : > { %v2759_v39 = vpop.f32.mrb[52].mxu0 }
 0xfc8   : > { %v3983_v40 = vpop.f32.mrb[53].mxu0 }
 0xfc9   : > { %v2762_v41 = vpop.f32.mrb[54].mxu0  ;;  %v4210_v40 = vld [vmem:[#allocation5 + $0x38] sm:$0xff]  }
 0xfca   : > { %v3984_v42 = vpop.f32.mrb[55].mxu0  ;;  %v4211_v41 = vld [vmem:[%s5314_s13 + $0x40] sm:$0xff]  }
 0xfcb   : > { %v4212_v42 = vld [vmem:[%s5314_s13 + $0x48] sm:$0xff]  }
0x1020   : > { %v2805_v43 = vpop.f32.mrb[68].mxu1 }
0x1021   : > { %3088 = vrot.lane.b32.xlu0 %v2805_v43, %s5364_s30  ;;  %v3989_v44 = vpop.f32.mrb[69].mxu1  ;;  %v4213_v43 = vld [vmem:[%s5314_s13 + $0x50] sm:$0xff]   ;;  %s4441_s30 = smov [#allocation7]  }
0x1022   : > { %v2808_v45 = vpop.f32.mrb[70].mxu1  ;;  %v4214_v44 = vld [vmem:[%s5314_s13 + $0x58] sm:$0xff]  }
0x1023   : > { %v3990_v46 = vpop.f32.mrb[71].mxu1  ;;  %v4215_v45 = vld [vmem:[%s5314_s13 + $0x60] sm:$0xff]  }
0x1024   : > { %v2851_v47 = vpop.f32.mrb[56].mxu0  ;;  %v4216_v46 = vld [vmem:[%s5314_s13 + $0x68] sm:$0xff]  }
0x1025   : > { %3092 = vrot.lane.b32.xlu1 %v2851_v47, %s5365_s23  ;;  %v3995_v48 = vpop.f32.mrb[57].mxu0  ;;  %s4351_s23 = sshll.u32 %s4441_s30, 4  ;;  %s4352_s23 = int_to_ptr.vmem [resolvable:$false] %s4351_s23 }
0x1026   : > { %v2854_v49 = vpop.f32.mrb[58].mxu0 }
0x1027   : > { %v3996_v50 = vpop.f32.mrb[59].mxu0 }
0x1055   : > { %v2897_v53 = vpop.f32.mrb[72].mxu1 }
0x1056   : > { %3096 = vrot.lane.b32.xlu0 %v2897_v53, %s5366_s26  ;;  %v4001_v55 = vpop.f32.mrb[73].mxu1  ;;  %s511_s26 = sand.u32 1, %s5371_s17   ;;  %s5373_s17 = sld [smem:[#allocation19_spill]] }
0x1057   : > { %v2900_v56 = vpop.f32.mrb[74].mxu1  ;;  %s3445_s22 = scalar_lea.sflag [#allocation4], %s511_s26 }
0x1058   : > { %v4002_v57 = vpop.f32.mrb[75].mxu1  ;;  %v3650_v56 = vld [vmem:[%s5310_s9 + $0x1] ss:$0 sm:$0xff] }
0x1059   : > { %v2943_v59 = vpop.f32.mrb[60].mxu0 }
0x105a   : > { %3100 = vrot.lane.b32.xlu1 %v2943_v59, %s5367_s20  ;;  %v4007_v60 = vpop.f32.mrb[61].mxu0  ;;  %s3544_s20 = sshll.u32 %s511_s26, 2 }
0x105b   : > { %v2946_v61 = vpop.f32.mrb[62].mxu0  ;;  %s513_s27 = scalar_lea.vmem [#allocation7], %s3544_s20  ;;  %s4353_s20 = scalar_lea.vmem %s4352_s23, 128 }
0x105c   : > { %v4008_v63 = vpop.f32.mrb[63].mxu0  ;;  %s3458_s24 = sshll.u32 %s513_s27, 4  ;;  %s5259_s25 = scalar_lea.hbm %s5373_s17, %s3686_s16  ;;  %s5261_s24 = int_to_ptr.vmem [resolvable:$true] %s3458_s24 }
0x105d   : > { %v2989_v1 = vpop.f32.mrb[76].mxu1  ;;  %v4217_v63 = vld [vmem:[%s5314_s13 + $0x70] sm:$0xff]   ;;  %s4347_s15 = scalar_lea.vmem %s5261_s24, 64  ;;  %p4354_p4 = scmp.lt.s32.totalorder %s5261_s24, %s4352_s23 }
0x105e   : > { %3104 = vrot.lane.b32.xlu0 %v2989_v1, %s5368_s18  ;;  %v4013_v3 = vpop.f32.mrb[77].mxu1  ;;  %v4218_v1 = vld [vmem:[%s5314_s13 + $0x78] sm:$0xff]   ;;  %p4348_p10 = scmp.ne.s32.totalorder %s5261_s24, %s4347_s15  ;;  %p4355_p7 = scmp.lt.s32.totalorder %s4353_s20, %s4347_s15 }
0x105f   : > { %v2992_v4 = vpop.f32.mrb[78].mxu1  ;;  %v3653_v3 = vld [vmem:[%s5313_s12 + $0x1] ss:$0 sm:$0xff] }
0x1060   : > { %v4014_v5 = vpop.f32.mrb[79].mxu1  ;;  %p4356_p8 = por %p4355_p7, %p4354_p4 }
0x1061   : > { %v3035_v6 = vpop.f32.mrb[64].mxu0 }
0x1062   : > { %3108 = vrot.lane.b32.xlu1 %v3035_v6, %s5369_s29  ;;  %v4019_v7 = vpop.f32.mrb[65].mxu0 }
0x1063   : > { %v3038_v62 = vpop.f32.mrb[66].mxu0 }
0x1064   : > { %v4020_v54 = vpop.f32.mrb[67].mxu0 }
0x1065   : > { %v3081_v8 = vpop.f32.mrb[80].mxu1 }
0x1066   : > { %3112 = vrot.lane.b32.xlu0 %v3081_v8, %s5370_s21  ;;  %v4025_v9 = vpop.f32.mrb[81].mxu1  ;;  %s5372_s21 = sld [smem:[#allocation17_spill]] }
0x1067   : > { %v3084_v10 = vpop.f32.mrb[82].mxu1 }
0x1068   : > { %v4026_v11 = vpop.f32.mrb[83].mxu1 }
0x106c   : > { %p5374_p1 = scmp.ne.s32.totalorder %s5372_s21, 0 }
0x106e   : > { %p4349_p2 = pnand %p4348_p10, %p5374_p1 }
0x1070   : > { %p4350_p3 = pneg %p4349_p2 }
0x1072   : > { %p4357_p11 = pnand %p4356_p8, %p4350_p3 }
0x1093   : > { %v3089_v12 = vpop.permute.xlu0 %3088 }
0x1094   : > { %v3115_v15 = vsel %vm829_vm6, %v2759_v39, %v3089_v12  ;;  %v4208_v39 = vld [vmem:[#allocation5 + $0x28] sm:$0xff]  }
0x1095   : > { %4042 = vmatpush3.bf16.msra.mxu1 %v4208_v39 }
0x1096   : > { %4043 = vmatprep.subr.bf16.mxu1 %v4429_v2 }
0x1097   : > { %v3093_v13 = vpop.permute.xlu1 %3092 }
0x1098   : > { %v3116_v16 = vsel %vm1720_vm7, %v3115_v15, %v3093_v13 }
0x10c8   : > { %v3097_v14 = vpop.permute.xlu0 %3096 }
0x10c9   : > { %v3117_v18 = vsel %vm1722_vm8, %v3116_v16, %v3097_v14 }
0x10cc   : > { %v3101_v0 = vpop.permute.xlu1 %3100 }
0x10cd   : > { %v3118_v20 = vsel %vm1724_vm9, %v3117_v18, %v3101_v0 }
0x10d0   : > { %v3105_v17 = vpop.permute.xlu0 %3104 }
0x10d1   : > { %v3119_v21 = vsel %vm1726_vm10, %v3118_v20, %v3105_v17 }
0x10d4   : > { %v3109_v19 = vpop.permute.xlu1 %3108 }
0x10d5   : > { %v3120_v22 = vsel %vm1728_vm11, %v3119_v21, %v3109_v19 }
0x10d8   : > { %v3113_v23 = vpop.permute.xlu0 %3112 }
0x10d9   : > { %v3121_v24 = vsel %vm1730_vm12, %v3120_v22, %v3113_v23 }
0x10da   : > { %v3122_v26 = vpack.c.bf16 %v3121_v24, %v3121_v24 }
0x10dc   : > { %4036 = vmatmul.mubr.msk.bf16.vlgmr.msra.gmra.mrb[68].mxu0 %vm580_vm0, %v3122_v26 }
0x10dd   : > { %4067 = vmatprep.mubr.msk.bf16.mxu0 %vm4431_vm5, %v4429_v2  ;;  %4052 = vmatpush3.bf16.msra.mxu0 %v4211_v41 }
0x10de   : > { %4053 = vmatprep.subr.bf16.mxu0 %v4429_v2 }
0x10e1   : > { %4054 = vmatpush3.bf16.msra.mxu0 %v4212_v42 }
0x10e2   : > { %4055 = vmatprep.subr.bf16.mxu0 %v4429_v2 }
0x10e5   : > { %4056 = vmatpush3.bf16.msra.mxu0 %v4213_v43 }
0x10e6   : > { %4057 = vmatprep.subr.bf16.mxu0 %v4429_v2 }
0x10e9   : > { %4058 = vmatpush3.bf16.msra.mxu0 %v4214_v44 }
0x10ea   : > { %4059 = vmatprep.subr.bf16.mxu0 %v4429_v2 }
0x10ed   : > { %4060 = vmatpush3.bf16.msra.mxu0 %v4215_v45 }
0x10ee   : > { %4061 = vmatprep.subr.bf16.mxu0 %v4429_v2 }
0x10f1   : > { %4062 = vmatpush3.bf16.msra.mxu0 %v4216_v46 }
0x10f2   : > { %4063 = vmatprep.subr.bf16.mxu0 %v4429_v2 }
0x10f5   : > { %4064 = vmatpush3.bf16.msra.mxu0 %v4217_v63 }
0x10f6   : > { %4065 = vmatprep.subr.bf16.mxu0 %v4429_v2 }
0x10f9   : > { %4066 = vmatpush3.bf16.msra.mxu0 %v4218_v1 }
0x11af   : > { %v3201_v28 = vpop.f32.mrb[68].mxu0 }
0x11b0   : > { %v3202_v29 = vadd.f32 %v3642_v27, %v3201_v28  ;;  %v4037_v30 = vpop.f32.mrb[69].mxu0 }
0x11b1   : > { %v3204_v31 = vpop.f32.mrb[70].mxu0 }
0x11b2   : > { %v5198_v32 = vadd.f32 %v3202_v29, %v4974_v25  ;;  %v4038_v33 = vpop.f32.mrb[71].mxu0  ;;  %v4209_v25 = vld [vmem:[#allocation5 + $0x30] sm:$0xff]  }
0x11b3   : > { %4044 = vmatpush3.bf16.msra.mxu1 %v4209_v25 }
0x11b4   : > { %v3212_v35 = vsel %vm580_vm0, %v5198_v32, 0.0  ;;  %v3216_v36 = vmul.f32 %v5198_v32, %v5198_v32  ;;  %4045 = vmatprep.subr.bf16.mxu1 %v4429_v2  ;;  %v3676_v2 = vld [vmem:[%s5315_s14 + $0x1] ss:$0 sm:$0xff] }
0x11b5   : > { %3213 = vadd.xlane.f32.xlu1 %v3212_v35 }
0x11b6   : > { %v3217_v37 = vsel %vm580_vm0, %v3216_v36, 0.0 }
0x11b7   : > { %3218 = vadd.xlane.f32.xlu0 %v3217_v37  ;;  %4046 = vmatpush3.bf16.msra.mxu1 %v4210_v40 }
0x1242   : > { %v3214_v47 = vpop.xlane.xlu1 %3213 }
0x1243   : > { %v3215_v48 = vmul.f32 0.015625, %v3214_v47 }
0x1244   : > { %v3219_v49 = vpop.xlane.xlu0 %3218 }
0x1245   : > { %v3221_v50 = vmul.f32 %v3215_v48, %v3215_v48  ;;  %v3220_v34 = vmul.f32 0.015625, %v3219_v49  ;;  %v3223_v53 = vsub.f32 %v5198_v32, %v3215_v48 }
0x1247   : > { %v3222_v51 = vsub.f32 %v3220_v34, %v3221_v50 }
0x1249   : > { %v3224_v52 = vadd.f32 1e-05, %v3222_v51 }
0x124b   : > { %4289 = vrsqrt.f32 %v3224_v52 }
0x1255   : > { %v4290_v55 = vpop.eup %4289 }
0x1256   : > { %v3226_v57 = vmul.f32 %v4290_v55, %v3223_v53 }
0x1258   : > { %v3233_v59 = vmul.f32 %v3650_v56, %v3226_v57 }
0x125a   : > { %v3240_v60 = vadd.f32 %v3651_v58, %v3233_v59 }
0x125c   : > { %v3241_v61 = vpack.c.bf16 %v3240_v60, %v3240_v60 }
0x125e   : > { %4048 = vmatmul.mubr.msk.bf16.vlgmr.msra.gmra.mrb[84].mxu1 %vm580_vm0, %v3241_v61 }
0x1331   : > { %v3320_v4 = vpop.f32.mrb[84].mxu1 }
0x1332   : > { %v3321_v5 = vadd.f32 %v3653_v3, %v3320_v4  ;;  %v4049_v6 = vpop.f32.mrb[85].mxu1 }
0x1333   : > { %v3323_v7 = vpop.f32.mrb[86].mxu1 }
0x1334   : > { %v3326_v62 = vmax.f32 %v3321_v5, 0.0  ;;  %v4050_v54 = vpop.f32.mrb[87].mxu1 }
0x1336   : > { %v3327_v8 = vpack.c.bf16 %v3326_v62, %v3326_v62 }
0x1338   : > { %4068 = vmatmul.mubr.bf16.vlgmr.msra.gmra.mrb[72].mxu0 %v3327_v8 }
0x140b   : > { %v3435_v9 = vpop.f32.mrb[72].mxu0 }
0x140c   : > { %v3436_v10 = vadd.f32 %v3676_v2, %v3435_v9  ;;  %v4069_v11 = vpop.f32.mrb[73].mxu0 }
0x140d   : > { %v3438_v12 = vpop.f32.mrb[74].mxu0 }
0x140e   : > { %v3441_v13 = vadd.f32 %v3436_v10, %v5198_v32  ;;  %v4070_v14 = vpop.f32.mrb[75].mxu0 }
0x1410   : > { %3443 = vst.msk [vmem:[%s513_s27 - $0x4] sm:$0xf0] %vm3442_vm13, %v3441_v13 }
0x1411   : > { %4360 = shalt.err (!%p4357_p11)
}
0x1412   : > { %s4361_s26 = scalar_lea.hbm %s5259_s25, 64  ;;  %s4365_s16 = scalar_lea.hbm %s5373_s17, 128 }
0x1413   : > { %p4362_p13 = scmp.ne.s32.totalorder %s5259_s25, %s4361_s26  ;;  %p4366_p6 = scmp.lt.u32.totalorder %s5259_s25, %s5373_s17 }
0x1414   : > { %p4367_p9 = scmp.lt.u32.totalorder %s4365_s16, %s4361_s26  ;;  %p4369_p10 = scmp.lt.u32.totalorder %s4361_s26, %s5259_s25 }
0x1415   : > { %p4363_p5 = pnand %p4362_p13, %p5374_p1 }
0x1416   : > { %p4368_p12 = por %p4367_p9, %p4366_p6 }
0x1417   : > { %p4364_p0 = pneg %p4363_p5 }
0x1418   : > { %p4370_p2 = por %p4369_p10, %p4368_p12 }
0x141a   : > { %p4371_p3 = pnand %p4370_p2, %p4364_p0 }
0x141c   : > { %4374 = shalt.err (!%p4371_p3)
}
0x141d   : > { %4079 = dma.vmem_to_hbm [thread:$0]  (%p5374_p1), %s5261_s24, 64, %s5259_s25, %s3445_s22  }
0x141e PF: > { %s5375_s19 = sld [smem:[#allocation14_spill]]  ;;  %s5376_s15 = sld [smem:[#allocation11_spill]] }
0x141f   : > { %s5377_s30 = sld [smem:[#allocation18_spill]] }
0x1424   : > { %p4096_p4 = scmp.ge.s32.totalorder %s5375_s19, 2  ;;  %s3470_s23 = sand.u32 1, %s5376_s15  }
0x1425   : > { %p5378_p7 = scmp.ne.s32.totalorder %s5377_s30, 0  ;;  %s3471_s20 = scalar_lea.sflag [#allocation4], %s3470_s23 }
0x1427   : > { %p4089_p8 = pnand %p4096_p4, %p5378_p7 }
0x1429   : > { %4400 = dma.done.wait (!%p4089_p8), %s3471_s20, 64  }
0x142a   : > { %4402 = vsyncadd (!%p4089_p8), %s3471_s20, 4294967232  ;;  %s5379_s21 = sld [smem:[#allocation15_spill]]  ;;  %s5380_s18 = sld [smem:[#allocation12_spill]] }
0x142b   : > { %s5381_s19 = sld [smem:[#allocation13_spill]]  ;;  %s5382_s20 = sld [smem:[#allocation16_spill]] }
0x1430   : > { %p27_p11 = scmp.ge.s32.totalorder %s5379_s21, 4  }
0x1432   :  { %29 = sbr.rel (!%p27_p11) target bundleno = 7 (0x7), region = 135 }
0x1439   :  { %3476 = vsyncpa [#allocation3], 1 }
0x143a   :  { %3478 = vsyncpa [#allocation3 + $0x1], 1 }
0x143b   :  { %3479 = vsyncpa [#allocation6], 1 }
0x143c   :  { %3480 = vsyncpa [#allocation4], 1 }
0x143d   :  { %3482 = vsyncpa [#allocation4 + $0x1], 1 }

</bundles_post_ra>
